<compile_context>
chip_gen: v6e
topology: v6e:2x2x1
jax: 0.10.0
libtpu: 0.0.40
codegen_flags: <defaults>
</compile_context>

<pallas_src>
import functools

import jax
import jax.numpy as jnp
from jax.experimental import pallas as pl
from jax.experimental.pallas import tpu as pltpu


def _round_up(x, m):
    return (x + m - 1) // m * m


def _composite_loss_kernel(background_weight, n_channels,
                           xi_ref, ti_ref,
                           xr0_ref, xs0_ref, tr0_ref,
                           xr1_ref, xs1_ref, tr1_ref,
                           out_ref, acc_ref):
    """Per-spatial-tile masked reductions for CompositeLoss.

    acc_ref (SMEM f32[8]) running sums:
      [0] weighted BCE-with-logits sum over the bce mask (broadcast over C)
      [1] |bce_mask|  (count of selected (b, hw) positions)
      [2] |reg_mask|  (count of selected (b, c, hw) positions)
      [3] laplace-loss sum for vector 0 over the reg mask
      [4] laplace-loss sum for vector 1 over the reg mask
    out_ref (SMEM f32[8]) = acc, written once at the last grid step.
    """
    j = pl.program_id(0)

    @pl.when(j == 0)
    def _init():
        for k in range(8):
            acc_ref[k] = jnp.float32(0.0)

    zero = jnp.float32(0.0)
    xi = xi_ref[...].astype(jnp.float32)            # (B, C, T)
    ti_full = ti_ref[...].astype(jnp.float32)       # (B, C+1, T)

    # bce mask: sum over all C+1 target channels > 0.5  -> (B, 1, T).
    bce_mask = jnp.sum(ti_full, axis=1, keepdims=True) > 0.5
    ti = ti_full[:, :n_channels, :]                 # drop background channel
    reg_mask = ti > 0.5                             # (B, C, T)

    # Stable binary_cross_entropy_with_logits; the mean is taken in the wrapper.
    bce_el = jnp.maximum(xi, zero) - xi * ti + jnp.log1p(jnp.exp(-jnp.abs(xi)))
    if background_weight != 1.0:    # trace-time skip in the default config
        bce_el = bce_el * jnp.where(ti == zero,
                                    jnp.float32(background_weight),
                                    jnp.float32(1.0))
    bce_sum = jnp.sum(jnp.where(bce_mask, bce_el, zero))   # mask broadcasts over C
    bce_count = jnp.sum(bce_mask.astype(jnp.float32))
    reg_count = jnp.sum(reg_mask.astype(jnp.float32))

    def laplace_sum(xr_ref, xs_ref, tr_ref):
        # xr/tr: (B, C, 2, T) -- the two components combined via a sublane sum.
        d = xr_ref[...].astype(jnp.float32) - tr_ref[...].astype(jnp.float32)
        norm = jnp.sqrt(jnp.sum(d * d, axis=2))     # (B, C, T)
        logb = xs_ref[...].astype(jnp.float32)
        losses = 0.694 + logb + norm * jnp.exp(-logb)
        return jnp.sum(jnp.where(reg_mask, losses, zero))

    lap0 = laplace_sum(xr0_ref, xs0_ref, tr0_ref)
    lap1 = laplace_sum(xr1_ref, xs1_ref, tr1_ref)

    acc_ref[0] += bce_sum
    acc_ref[1] += bce_count
    acc_ref[2] += reg_count
    acc_ref[3] += lap0
    acc_ref[4] += lap1

    @pl.when(j == pl.num_programs(0) - 1)
    def _finalize():
        for k in range(8):
            out_ref[k] = acc_ref[k]


@functools.partial(jax.jit, static_argnums=(8, 9))
def _tail_stats(xi, ti_full, xr0, xs0, tr0, xr1, xs1, tr1,
                background_weight, n_channels):
    """Pure-JAX partial sums for the (< one lane-tile) ragged spatial tail."""
    xi = xi.astype(jnp.float32)
    ti_full = ti_full.astype(jnp.float32)
    bce_mask = jnp.sum(ti_full, axis=1, keepdims=True) > 0.5
    ti = ti_full[:, :n_channels]
    bce_el = jnp.maximum(xi, 0.0) - xi * ti + jnp.log1p(jnp.exp(-jnp.abs(xi)))
    if background_weight != 1.0:
        bce_el = bce_el * jnp.where(ti == 0.0, background_weight, 1.0)
    bce_sum = jnp.sum(jnp.where(bce_mask, bce_el, 0.0))
    bce_count = jnp.sum(bce_mask.astype(jnp.float32))
    reg_mask = ti > 0.5
    reg_count = jnp.sum(reg_mask.astype(jnp.float32))

    def lap(xr, xs, tr):
        d = xr.astype(jnp.float32) - tr.astype(jnp.float32)
        norm = jnp.sqrt(jnp.sum(d * d, axis=2))
        logb = xs.astype(jnp.float32)
        losses = 0.694 + logb + norm * jnp.exp(-logb)
        return jnp.sum(jnp.where(reg_mask, losses, 0.0))

    zero = jnp.float32(0.0)
    return jnp.stack([bce_sum, bce_count, reg_count,
                      lap(xr0, xs0, tr0), lap(xr1, xs1, tr1),
                      zero, zero, zero])


def composite_loss(x, t, *, background_weight=1.0, n_vectors=2, lane_tile=512):
    """Pallas implementation of CompositeLoss.forward (default n_scales=0 config).

    x: [x_intensity (B,C,H,W), x_reg_0 (B,C,2,H,W), x_reg_1,
        x_spread_0 (B,C,H,W), x_spread_1]
    t: [t_intensity (B,C+1,H,W), t_reg_0 (B,C,2,H,W), t_reg_1, t_scale (B,C,H,W)]
    """
    assert n_vectors == 2, "kernel specialized for the default n_vectors=2"
    x_intensity = x[0]
    x_regs = list(x[1:1 + n_vectors])
    x_spreads = list(x[1 + n_vectors:1 + 2 * n_vectors])
    t_intensity = t[0]
    t_regs = list(t[1:1 + n_vectors])
    # t[-1] (target_scale) unused: laplace_loss has no `.scale`, n_scales == 0.
    # TODO(synk): n_scales > 0 scale L1 losses and multiplicity_correction are
    # not exercised by the default config and are omitted.

    B, C, H, W = x_intensity.shape
    HW = H * W

    def flat(a):
        return a.reshape(*a.shape[:-2], HW)        # free (contiguous) reshape

    xi, ti = flat(x_intensity), flat(t_intensity)
    xr = [flat(a) for a in x_regs]
    xs = [flat(a) for a in x_spreads]
    tr = [flat(a) for a in t_regs]

    # Lane tile: multiple of 128, capped by the spatial extent and by a VMEM
    # budget for the double-buffered input windows.
    T = max(128, (min(max(lane_tile, 128), HW) // 128) * 128)

    def vmem_estimate(tile):
        ru8 = lambda v: _round_up(v, 8)
        rows = B * (3 * ru8(C) + ru8(C + 1) + 2 * n_vectors * 8 * C)
        return 2 * rows * tile * 4                 # double-buffered, f32 bound

    while T > 128 and vmem_estimate(T) > 24 * 1024 * 1024:
        T -= 128

    hw_main = (HW // T) * T
    tail = HW - hw_main
    if hw_main == 0:
        # Tiny spatial extent (< 128): zero-pad to one lane tile (cheap; zero
        # targets keep both masks zero on padded lanes).
        pad3 = [(0, 0), (0, 0), (0, T - HW)]
        pad4 = [(0, 0), (0, 0), (0, 0), (0, T - HW)]
        xi, ti = jnp.pad(xi, pad3), jnp.pad(ti, pad3)
        xr = [jnp.pad(a, pad4) for a in xr]
        xs = [jnp.pad(a, pad3) for a in xs]
        tr = [jnp.pad(a, pad4) for a in tr]
        hw_main, tail = T, 0

    grid = hw_main // T
    spec3 = lambda nch: pl.BlockSpec((B, nch, T), lambda j: (0, 0, j))
    spec4 = pl.BlockSpec((B, C, 2, T), lambda j: (0, 0, 0, j))
    in_specs = [spec3(C), spec3(C + 1)]
    inputs = [xi, ti]
    for i in range(n_vectors):
        in_specs += [spec4, spec3(C), spec4]
        inputs += [xr[i], xs[i], tr[i]]

    kernel = functools.partial(_composite_loss_kernel,
                               float(background_weight), C)
    stats = pl.pallas_call(
        kernel,
        out_shape=jax.ShapeDtypeStruct((8,), jnp.float32),
        grid=(grid,),
        in_specs=in_specs,
        out_specs=pl.BlockSpec(memory_space=pltpu.MemorySpace.SMEM),
        scratch_shapes=[pltpu.SMEM((8,), jnp.float32)],
        compiler_params=pltpu.CompilerParams(
            dimension_semantics=("arbitrary",),
            vmem_limit_bytes=32 * 1024 * 1024),
    )(*inputs)

    if tail > 0:
        # Ragged remainder (< one lane tile) folded in with tiny plain-JAX ops
        # on the contiguous tail slices -- avoids re-copying (padding) every
        # full input tensor in HBM just for lane alignment.
        stats = stats + _tail_stats(
            xi[..., hw_main:], ti[..., hw_main:],
            xr[0][..., hw_main:], xs[0][..., hw_main:], tr[0][..., hw_main:],
            xr[1][..., hw_main:], xs[1][..., hw_main:], tr[1][..., hw_main:],
            float(background_weight), C)

    # Final divisions stay on device (tiny ops on the 8-float stats vector).
    ce_loss = stats[0] / (jnp.float32(C) * stats[1])
    scale = jnp.float32(1.0 / (1000.0 * B))
    reg_losses = [stats[3] * scale, stats[4] * scale]

    # Single small device->host fetch drives the PyTorch early-exit / None
    # semantics (mirrors torch's host sync on torch.sum(bce_masks)).
    counts = jax.device_get(stats[1:3])
    if float(counts[0]) < 1.0:
        return (None, None, None)
    if float(counts[1]) <= 0.0:
        reg_losses = [None for _ in range(n_vectors)]
    # TODO(synk): a leading "parallel" grid axis with per-core partial sums
    # would let v7x use both TensorCores; omitted (kernel is HBM-bound).
    return [ce_loss] + reg_losses


def _reference(x, t, background_weight=1.0, n_vectors=2):
    """Pure-JAX reference mirroring the PyTorch forward."""
    xi = x[0].astype(jnp.float32)
    ti_full = t[0].astype(jnp.float32)
    bce_mask = jnp.sum(ti_full, axis=1, keepdims=True) > 0.5
    ti = ti_full[:, :-1]
    bce_el = jnp.maximum(xi, 0.0) - xi * ti + jnp.log1p(jnp.exp(-jnp.abs(xi)))
    w = jnp.where(ti == 0.0, background_weight, 1.0)
    m = jnp.broadcast_to(bce_mask, ti.shape)
    ce = jnp.sum(jnp.where(m, bce_el * w, 0.0)) / jnp.sum(m.astype(jnp.float32))
    reg_mask = ti > 0.5
    B = xi.shape[0]
    regs = []
    for i in range(n_vectors):
        xr = x[1 + i].astype(jnp.float32)
        xsp = x[1 + n_vectors + i].astype(jnp.float32)
        trg = t[1 + i].astype(jnp.float32)
        norm = jnp.sqrt((xr[:, :, 0] - trg[:, :, 0]) ** 2
                        + (xr[:, :, 1] - trg[:, :, 1]) ** 2)
        l = 0.694 + xsp + norm * jnp.exp(-xsp)
        regs.append(jnp.sum(jnp.where(reg_mask, l, 0.0)) / 1000.0 / B)
    return [ce] + regs


def _make_inputs(key, B, C, H, W):
    ks = jax.random.split(key, 9)
    x_intensity = jax.random.normal(ks[0], (B, C, H, W), jnp.float32)
    x_reg0 = jax.random.normal(ks[1], (B, C, 2, H, W), jnp.float32)
    x_reg1 = jax.random.normal(ks[2], (B, C, 2, H, W), jnp.float32)
    x_spread0 = 0.5 * jax.random.normal(ks[3], (B, C, H, W), jnp.float32)
    x_spread1 = 0.5 * jax.random.normal(ks[4], (B, C, H, W), jnp.float32)
    x = [x_intensity, x_reg0, x_reg1, x_spread0, x_spread1]
    t_intensity = jax.random.bernoulli(ks[5], 0.3, (B, C + 1, H, W)).astype(jnp.float32)
    t_reg0 = jax.random.normal(ks[6], (B, C, 2, H, W), jnp.float32)
    t_reg1 = jax.random.normal(ks[7], (B, C, 2, H, W), jnp.float32)
    t_scale = jnp.abs(jax.random.normal(ks[8], (B, C, H, W), jnp.float32)) + 0.1
    t = [t_intensity, t_reg0, t_reg1, t_scale]
    return x, t


def _check(out, ref):
    for got, want in zip(out, ref):
        assert got is not None
        assert abs(float(got) - float(want)) <= 1e-4 + 1e-4 * abs(float(want)), \
            (float(got), float(want))


if __name__ == "__main__":
    key = jax.random.PRNGKey(0)
    k1, k2 = jax.random.split(key)

    # Lane-aligned spatial extent (HW = 256): whole reduction in-kernel.
    x, t = _make_inputs(k1, B=2, C=4, H=16, W=16)
    out = jax.block_until_ready(composite_loss(x, t))
    ref = jax.block_until_ready(_reference(x, t))
    _check(out, ref)

    # Ragged spatial extent (HW = 130) + non-default background weight:
    # kernel covers the aligned prefix, tiny JAX tail covers the remainder.
    x, t = _make_inputs(k2, B=2, C=4, H=10, W=13)
    out = jax.block_until_ready(composite_loss(x, t, background_weight=0.5))
    ref = jax.block_until_ready(_reference(x, t, background_weight=0.5))
    _check(out, ref)

    print("KERNEL_OK")
</pallas_src>

<mosaic_0001>
module attributes {stable_mosaic.version = 11 : i64} {
  func.func @_composite_loss_kernel(%arg0: i32, %arg1: memref<2x4x256xf32, #tpu.memory_space<vmem>>, %arg2: memref<2x5x256xf32, #tpu.memory_space<vmem>>, %arg3: memref<2x4x2x256xf32, #tpu.memory_space<vmem>>, %arg4: memref<2x4x256xf32, #tpu.memory_space<vmem>>, %arg5: memref<2x4x2x256xf32, #tpu.memory_space<vmem>>, %arg6: memref<2x4x2x256xf32, #tpu.memory_space<vmem>>, %arg7: memref<2x4x256xf32, #tpu.memory_space<vmem>>, %arg8: memref<2x4x2x256xf32, #tpu.memory_space<vmem>>, %arg9: memref<8xf32, #tpu.memory_space<smem>>, %arg10: memref<8xf32, #tpu.memory_space<smem>>) attributes {dimension_semantics = [#tpu.dimension_semantics<arbitrary>], iteration_bounds = array<i64: 1>, scalar_prefetch = 0 : i64, scratch_operands = 1 : i64, tpu.core_type = #tpu.core_type<tc>, window_params = [{transform_indices = @transform_0, window_bounds = array<i64: 2, 4, 256>}, {transform_indices = @transform_1, window_bounds = array<i64: 2, 5, 256>}, {transform_indices = @transform_2, window_bounds = array<i64: 2, 4, 2, 256>}, {transform_indices = @transform_3, window_bounds = array<i64: 2, 4, 256>}, {transform_indices = @transform_4, window_bounds = array<i64: 2, 4, 2, 256>}, {transform_indices = @transform_5, window_bounds = array<i64: 2, 4, 2, 256>}, {transform_indices = @transform_6, window_bounds = array<i64: 2, 4, 256>}, {transform_indices = @transform_7, window_bounds = array<i64: 2, 4, 2, 256>}, {transform_indices = @transform_8, window_bounds = array<i64: 8>}]} {
    %c0_i32 = arith.constant 0 : i32
    %0 = arith.cmpi eq, %arg0, %c0_i32 : i32
    %1 = arith.extui %0 : i1 to i32
    %c0_i32_0 = arith.constant 0 : i32
    %2 = arith.cmpi ne, %1, %c0_i32_0 : i32
    scf.if %2 {
      %cst_54 = arith.constant 0.000000e+00 : f32
      %c0_55 = arith.constant 0 : index
      %100 = memref.load %arg10[%c0_55] : memref<8xf32, #tpu.memory_space<smem>>
      memref.store %cst_54, %arg10[%c0_55] : memref<8xf32, #tpu.memory_space<smem>>
      %cst_56 = arith.constant 0.000000e+00 : f32
      %c1_57 = arith.constant 1 : index
      %101 = memref.load %arg10[%c1_57] : memref<8xf32, #tpu.memory_space<smem>>
      memref.store %cst_56, %arg10[%c1_57] : memref<8xf32, #tpu.memory_space<smem>>
      %cst_58 = arith.constant 0.000000e+00 : f32
      %c2_59 = arith.constant 2 : index
      %102 = memref.load %arg10[%c2_59] : memref<8xf32, #tpu.memory_space<smem>>
      memref.store %cst_58, %arg10[%c2_59] : memref<8xf32, #tpu.memory_space<smem>>
      %cst_60 = arith.constant 0.000000e+00 : f32
      %c3_61 = arith.constant 3 : index
      %103 = memref.load %arg10[%c3_61] : memref<8xf32, #tpu.memory_space<smem>>
      memref.store %cst_60, %arg10[%c3_61] : memref<8xf32, #tpu.memory_space<smem>>
      %cst_62 = arith.constant 0.000000e+00 : f32
      %c4_63 = arith.constant 4 : index
      %104 = memref.load %arg10[%c4_63] : memref<8xf32, #tpu.memory_space<smem>>
      memref.store %cst_62, %arg10[%c4_63] : memref<8xf32, #tpu.memory_space<smem>>
      %cst_64 = arith.constant 0.000000e+00 : f32
      %c5 = arith.constant 5 : index
      %105 = memref.load %arg10[%c5] : memref<8xf32, #tpu.memory_space<smem>>
      memref.store %cst_64, %arg10[%c5] : memref<8xf32, #tpu.memory_space<smem>>
      %cst_65 = arith.constant 0.000000e+00 : f32
      %c6 = arith.constant 6 : index
      %106 = memref.load %arg10[%c6] : memref<8xf32, #tpu.memory_space<smem>>
      memref.store %cst_65, %arg10[%c6] : memref<8xf32, #tpu.memory_space<smem>>
      %cst_66 = arith.constant 0.000000e+00 : f32
      %c7 = arith.constant 7 : index
      %107 = memref.load %arg10[%c7] : memref<8xf32, #tpu.memory_space<smem>>
      memref.store %cst_66, %arg10[%c7] : memref<8xf32, #tpu.memory_space<smem>>
    } else {
    }
    %c0 = arith.constant 0 : index
    %c0_1 = arith.constant 0 : index
    %c0_2 = arith.constant 0 : index
    %3 = vector.load %arg1[%c0, %c0_1, %c0_2] : memref<2x4x256xf32, #tpu.memory_space<vmem>>, vector<2x4x256xf32>
    %c0_3 = arith.constant 0 : index
    %c0_4 = arith.constant 0 : index
    %c0_5 = arith.constant 0 : index
    %4 = vector.load %arg2[%c0_3, %c0_4, %c0_5] : memref<2x5x256xf32, #tpu.memory_space<vmem>>, vector<2x5x256xf32>
    %cst = arith.constant dense<0.000000e+00> : vector<2x256xf32>
    %5 = vector.multi_reduction <add>, %4, %cst [1] : vector<2x5x256xf32> to vector<2x256xf32>
    %6 = vector.shape_cast %5 : vector<2x256xf32> to vector<2x1x256xf32>
    %cst_6 = arith.constant 5.000000e-01 : f32
    %7 = vector.broadcast %cst_6 : f32 to vector<2x1x256xf32>
    %8 = arith.cmpf ogt, %6, %7 : vector<2x1x256xf32>
    %9 = vector.extract_strided_slice %4 {offsets = [0, 0, 0], sizes = [2, 4, 256], strides = [1, 1, 1]} : vector<2x5x256xf32> to vector<2x4x256xf32>
    %cst_7 = arith.constant 5.000000e-01 : f32
    %10 = vector.broadcast %cst_7 : f32 to vector<2x4x256xf32>
    %11 = arith.cmpf ogt, %9, %10 : vector<2x4x256xf32>
    %cst_8 = arith.constant 0.000000e+00 : f32
    %12 = vector.broadcast %cst_8 : f32 to vector<2x4x256xf32>
    %13 = arith.maximumf %3, %12 : vector<2x4x256xf32>
    %14 = arith.mulf %3, %9 : vector<2x4x256xf32>
    %15 = arith.subf %13, %14 : vector<2x4x256xf32>
    %16 = math.absf %3 : vector<2x4x256xf32>
    %cst_9 = arith.constant 0.000000e+00 : f32
    %17 = vector.broadcast %cst_9 : f32 to vector<2x4x256xf32>
    %18 = arith.subf %17, %16 : vector<2x4x256xf32>
    %19 = math.exp %18 : vector<2x4x256xf32>
    %20 = math.log1p %19 : vector<2x4x256xf32>
    %21 = arith.addf %15, %20 : vector<2x4x256xf32>
    %cst_10 = arith.constant 0.000000e+00 : f32
    %22 = vector.shape_cast %8 : vector<2x1x256xi1> to vector<2x1x256xi1>
    %23 = vector.broadcast %22 : vector<2x1x256xi1> to vector<2x4x256xi1>
    %24 = vector.broadcast %cst_10 : f32 to vector<2x4x256xf32>
    %25 = arith.select %23, %21, %24 : vector<2x4x256xi1>, vector<2x4x256xf32>
    %26 = vector.shape_cast %25 : vector<2x4x256xf32> to vector<1x2x4x256xf32>
    %cst_11 = arith.constant dense<0.000000e+00> : vector<1xf32>
    %27 = vector.multi_reduction <add>, %26, %cst_11 [1, 2, 3] : vector<1x2x4x256xf32> to vector<1xf32>
    %28 = vector.shape_cast %27 : vector<1xf32> to vector<1x1x1x1xf32>
    %29 = vector.extract %28[0, 0, 0, 0] : f32 from vector<1x1x1x1xf32>
    %30 = arith.extui %8 : vector<2x1x256xi1> to vector<2x1x256xi32>
    %31 = arith.sitofp %30 : vector<2x1x256xi32> to vector<2x1x256xf32>
    %32 = vector.shape_cast %31 : vector<2x1x256xf32> to vector<1x2x1x256xf32>
    %cst_12 = arith.constant dense<0.000000e+00> : vector<1xf32>
    %33 = vector.multi_reduction <add>, %32, %cst_12 [1, 2, 3] : vector<1x2x1x256xf32> to vector<1xf32>
    %34 = vector.shape_cast %33 : vector<1xf32> to vector<1x1x1x1xf32>
    %35 = vector.extract %34[0, 0, 0, 0] : f32 from vector<1x1x1x1xf32>
    %36 = arith.extui %11 : vector<2x4x256xi1> to vector<2x4x256xi32>
    %37 = arith.sitofp %36 : vector<2x4x256xi32> to vector<2x4x256xf32>
    %38 = vector.shape_cast %37 : vector<2x4x256xf32> to vector<1x2x4x256xf32>
    %cst_13 = arith.constant dense<0.000000e+00> : vector<1xf32>
    %39 = vector.multi_reduction <add>, %38, %cst_13 [1, 2, 3] : vector<1x2x4x256xf32> to vector<1xf32>
    %40 = vector.shape_cast %39 : vector<1xf32> to vector<1x1x1x1xf32>
    %41 = vector.extract %40[0, 0, 0, 0] : f32 from vector<1x1x1x1xf32>
    %c0_14 = arith.constant 0 : index
    %c0_15 = arith.constant 0 : index
    %c0_16 = arith.constant 0 : index
    %c0_17 = arith.constant 0 : index
    %42 = vector.load %arg3[%c0_14, %c0_15, %c0_16, %c0_17] : memref<2x4x2x256xf32, #tpu.memory_space<vmem>>, vector<2x4x2x256xf32>
    %c0_18 = arith.constant 0 : index
    %c0_19 = arith.constant 0 : index
    %c0_20 = arith.constant 0 : index
    %c0_21 = arith.constant 0 : index
    %43 = vector.load %arg5[%c0_18, %c0_19, %c0_20, %c0_21] : memref<2x4x2x256xf32, #tpu.memory_space<vmem>>, vector<2x4x2x256xf32>
    %44 = arith.subf %42, %43 : vector<2x4x2x256xf32>
    %45 = arith.mulf %44, %44 : vector<2x4x2x256xf32>
    %cst_22 = arith.constant dense<0.000000e+00> : vector<2x4x256xf32>
    %46 = vector.multi_reduction <add>, %45, %cst_22 [2] : vector<2x4x2x256xf32> to vector<2x4x256xf32>
    %47 = math.sqrt %46 : vector<2x4x256xf32>
    %c0_23 = arith.constant 0 : index
    %c0_24 = arith.constant 0 : index
    %c0_25 = arith.constant 0 : index
    %48 = vector.load %arg4[%c0_23, %c0_24, %c0_25] : memref<2x4x256xf32, #tpu.memory_space<vmem>>, vector<2x4x256xf32>
    %cst_26 = arith.constant 6.940000e-01 : f32
    %49 = vector.broadcast %cst_26 : f32 to vector<2x4x256xf32>
    %50 = arith.addf %49, %48 : vector<2x4x256xf32>
    %cst_27 = arith.constant 0.000000e+00 : f32
    %51 = vector.broadcast %cst_27 : f32 to vector<2x4x256xf32>
    %52 = arith.subf %51, %48 : vector<2x4x256xf32>
    %53 = math.exp %52 : vector<2x4x256xf32>
    %54 = arith.mulf %47, %53 : vector<2x4x256xf32>
    %55 = arith.addf %50, %54 : vector<2x4x256xf32>
    %cst_28 = arith.constant 0.000000e+00 : f32
    %56 = vector.broadcast %cst_28 : f32 to vector<2x4x256xf32>
    %57 = arith.select %11, %55, %56 : vector<2x4x256xi1>, vector<2x4x256xf32>
    %58 = vector.shape_cast %57 : vector<2x4x256xf32> to vector<1x2x4x256xf32>
    %cst_29 = arith.constant dense<0.000000e+00> : vector<1xf32>
    %59 = vector.multi_reduction <add>, %58, %cst_29 [1, 2, 3] : vector<1x2x4x256xf32> to vector<1xf32>
    %60 = vector.shape_cast %59 : vector<1xf32> to vector<1x1x1x1xf32>
    %61 = vector.extract %60[0, 0, 0, 0] : f32 from vector<1x1x1x1xf32>
    %c0_30 = arith.constant 0 : index
    %c0_31 = arith.constant 0 : index
    %c0_32 = arith.constant 0 : index
    %c0_33 = arith.constant 0 : index
    %62 = vector.load %arg6[%c0_30, %c0_31, %c0_32, %c0_33] : memref<2x4x2x256xf32, #tpu.memory_space<vmem>>, vector<2x4x2x256xf32>
    %c0_34 = arith.constant 0 : index
    %c0_35 = arith.constant 0 : index
    %c0_36 = arith.constant 0 : index
    %c0_37 = arith.constant 0 : index
    %63 = vector.load %arg8[%c0_34, %c0_35, %c0_36, %c0_37] : memref<2x4x2x256xf32, #tpu.memory_space<vmem>>, vector<2x4x2x256xf32>
    %64 = arith.subf %62, %63 : vector<2x4x2x256xf32>
    %65 = arith.mulf %64, %64 : vector<2x4x2x256xf32>
    %cst_38 = arith.constant dense<0.000000e+00> : vector<2x4x256xf32>
    %66 = vector.multi_reduction <add>, %65, %cst_38 [2] : vector<2x4x2x256xf32> to vector<2x4x256xf32>
    %67 = math.sqrt %66 : vector<2x4x256xf32>
    %c0_39 = arith.constant 0 : index
    %c0_40 = arith.constant 0 : index
    %c0_41 = arith.constant 0 : index
    %68 = vector.load %arg7[%c0_39, %c0_40, %c0_41] : memref<2x4x256xf32, #tpu.memory_space<vmem>>, vector<2x4x256xf32>
    %cst_42 = arith.constant 6.940000e-01 : f32
    %69 = vector.broadcast %cst_42 : f32 to vector<2x4x256xf32>
    %70 = arith.addf %69, %68 : vector<2x4x256xf32>
    %cst_43 = arith.constant 0.000000e+00 : f32
    %71 = vector.broadcast %cst_43 : f32 to vector<2x4x256xf32>
    %72 = arith.subf %71, %68 : vector<2x4x256xf32>
    %73 = math.exp %72 : vector<2x4x256xf32>
    %74 = arith.mulf %67, %73 : vector<2x4x256xf32>
    %75 = arith.addf %70, %74 : vector<2x4x256xf32>
    %cst_44 = arith.constant 0.000000e+00 : f32
    %76 = vector.broadcast %cst_44 : f32 to vector<2x4x256xf32>
    %77 = arith.select %11, %75, %76 : vector<2x4x256xi1>, vector<2x4x256xf32>
    %78 = vector.shape_cast %77 : vector<2x4x256xf32> to vector<1x2x4x256xf32>
    %cst_45 = arith.constant dense<0.000000e+00> : vector<1xf32>
    %79 = vector.multi_reduction <add>, %78, %cst_45 [1, 2, 3] : vector<1x2x4x256xf32> to vector<1xf32>
    %80 = vector.shape_cast %79 : vector<1xf32> to vector<1x1x1x1xf32>
    %81 = vector.extract %80[0, 0, 0, 0] : f32 from vector<1x1x1x1xf32>
    %c0_46 = arith.constant 0 : index
    %82 = memref.load %arg10[%c0_46] : memref<8xf32, #tpu.memory_space<smem>>
    %83 = arith.addf %82, %29 : f32
    %c0_47 = arith.constant 0 : index
    %84 = memref.load %arg10[%c0_47] : memref<8xf32, #tpu.memory_space<smem>>
    memref.store %83, %arg10[%c0_47] : memref<8xf32, #tpu.memory_space<smem>>
    %c1 = arith.constant 1 : index
    %85 = memref.load %arg10[%c1] : memref<8xf32, #tpu.memory_space<smem>>
    %86 = arith.addf %85, %35 : f32
    %c1_48 = arith.constant 1 : index
    %87 = memref.load %arg10[%c1_48] : memref<8xf32, #tpu.memory_space<smem>>
    memref.store %86, %arg10[%c1_48] : memref<8xf32, #tpu.memory_space<smem>>
    %c2 = arith.constant 2 : index
    %88 = memref.load %arg10[%c2] : memref<8xf32, #tpu.memory_space<smem>>
    %89 = arith.addf %88, %41 : f32
    %c2_49 = arith.constant 2 : index
    %90 = memref.load %arg10[%c2_49] : memref<8xf32, #tpu.memory_space<smem>>
    memref.store %89, %arg10[%c2_49] : memref<8xf32, #tpu.memory_space<smem>>
    %c3 = arith.constant 3 : index
    %91 = memref.load %arg10[%c3] : memref<8xf32, #tpu.memory_space<smem>>
    %92 = arith.addf %91, %61 : f32
    %c3_50 = arith.constant 3 : index
    %93 = memref.load %arg10[%c3_50] : memref<8xf32, #tpu.memory_space<smem>>
    memref.store %92, %arg10[%c3_50] : memref<8xf32, #tpu.memory_space<smem>>
    %c4 = arith.constant 4 : index
    %94 = memref.load %arg10[%c4] : memref<8xf32, #tpu.memory_space<smem>>
    %95 = arith.addf %94, %81 : f32
    %c4_51 = arith.constant 4 : index
    %96 = memref.load %arg10[%c4_51] : memref<8xf32, #tpu.memory_space<smem>>
    memref.store %95, %arg10[%c4_51] : memref<8xf32, #tpu.memory_space<smem>>
    %c0_i32_52 = arith.constant 0 : i32
    %97 = arith.cmpi eq, %arg0, %c0_i32_52 : i32
    %98 = arith.extui %97 : i1 to i32
    %c0_i32_53 = arith.constant 0 : i32
    %99 = arith.cmpi ne, %98, %c0_i32_53 : i32
    scf.if %99 {
      %c0_54 = arith.constant 0 : index
      %100 = memref.load %arg10[%c0_54] : memref<8xf32, #tpu.memory_space<smem>>
      %c0_55 = arith.constant 0 : index
      %101 = memref.load %arg9[%c0_55] : memref<8xf32, #tpu.memory_space<smem>>
      memref.store %100, %arg9[%c0_55] : memref<8xf32, #tpu.memory_space<smem>>
      %c1_56 = arith.constant 1 : index
      %102 = memref.load %arg10[%c1_56] : memref<8xf32, #tpu.memory_space<smem>>
      %c1_57 = arith.constant 1 : index
      %103 = memref.load %arg9[%c1_57] : memref<8xf32, #tpu.memory_space<smem>>
      memref.store %102, %arg9[%c1_57] : memref<8xf32, #tpu.memory_space<smem>>
      %c2_58 = arith.constant 2 : index
      %104 = memref.load %arg10[%c2_58] : memref<8xf32, #tpu.memory_space<smem>>
      %c2_59 = arith.constant 2 : index
      %105 = memref.load %arg9[%c2_59] : memref<8xf32, #tpu.memory_space<smem>>
      memref.store %104, %arg9[%c2_59] : memref<8xf32, #tpu.memory_space<smem>>
      %c3_60 = arith.constant 3 : index
      %106 = memref.load %arg10[%c3_60] : memref<8xf32, #tpu.memory_space<smem>>
      %c3_61 = arith.constant 3 : index
      %107 = memref.load %arg9[%c3_61] : memref<8xf32, #tpu.memory_space<smem>>
      memref.store %106, %arg9[%c3_61] : memref<8xf32, #tpu.memory_space<smem>>
      %c4_62 = arith.constant 4 : index
      %108 = memref.load %arg10[%c4_62] : memref<8xf32, #tpu.memory_space<smem>>
      %c4_63 = arith.constant 4 : index
      %109 = memref.load %arg9[%c4_63] : memref<8xf32, #tpu.memory_space<smem>>
      memref.store %108, %arg9[%c4_63] : memref<8xf32, #tpu.memory_space<smem>>
      %c5 = arith.constant 5 : index
      %110 = memref.load %arg10[%c5] : memref<8xf32, #tpu.memory_space<smem>>
      %c5_64 = arith.constant 5 : index
      %111 = memref.load %arg9[%c5_64] : memref<8xf32, #tpu.memory_space<smem>>
      memref.store %110, %arg9[%c5_64] : memref<8xf32, #tpu.memory_space<smem>>
      %c6 = arith.constant 6 : index
      %112 = memref.load %arg10[%c6] : memref<8xf32, #tpu.memory_space<smem>>
      %c6_65 = arith.constant 6 : index
      %113 = memref.load %arg9[%c6_65] : memref<8xf32, #tpu.memory_space<smem>>
      memref.store %112, %arg9[%c6_65] : memref<8xf32, #tpu.memory_space<smem>>
      %c7 = arith.constant 7 : index
      %114 = memref.load %arg10[%c7] : memref<8xf32, #tpu.memory_space<smem>>
      %c7_66 = arith.constant 7 : index
      %115 = memref.load %arg9[%c7_66] : memref<8xf32, #tpu.memory_space<smem>>
      memref.store %114, %arg9[%c7_66] : memref<8xf32, #tpu.memory_space<smem>>
    } else {
    }
    return
  }
  func.func @transform_0(%arg0: i32) -> (i32, i32, i32) {
    %c0_i32 = arith.constant 0 : i32
    %c0_i32_0 = arith.constant 0 : i32
    %c0_i32_1 = arith.constant 0 : i32
    return %c0_i32, %c0_i32_0, %arg0 : i32, i32, i32
  }
  func.func @transform_1(%arg0: i32) -> (i32, i32, i32) {
    %c0_i32 = arith.constant 0 : i32
    %c0_i32_0 = arith.constant 0 : i32
    %c0_i32_1 = arith.constant 0 : i32
    return %c0_i32, %c0_i32_0, %arg0 : i32, i32, i32
  }
  func.func @transform_2(%arg0: i32) -> (i32, i32, i32, i32) {
    %c0_i32 = arith.constant 0 : i32
    %c0_i32_0 = arith.constant 0 : i32
    %c0_i32_1 = arith.constant 0 : i32
    %c0_i32_2 = arith.constant 0 : i32
    return %c0_i32, %c0_i32_0, %c0_i32_1, %arg0 : i32, i32, i32, i32
  }
  func.func @transform_3(%arg0: i32) -> (i32, i32, i32) {
    %c0_i32 = arith.constant 0 : i32
    %c0_i32_0 = arith.constant 0 : i32
    %c0_i32_1 = arith.constant 0 : i32
    return %c0_i32, %c0_i32_0, %arg0 : i32, i32, i32
  }
  func.func @transform_4(%arg0: i32) -> (i32, i32, i32, i32) {
    %c0_i32 = arith.constant 0 : i32
    %c0_i32_0 = arith.constant 0 : i32
    %c0_i32_1 = arith.constant 0 : i32
    %c0_i32_2 = arith.constant 0 : i32
    return %c0_i32, %c0_i32_0, %c0_i32_1, %arg0 : i32, i32, i32, i32
  }
  func.func @transform_5(%arg0: i32) -> (i32, i32, i32, i32) {
    %c0_i32 = arith.constant 0 : i32
    %c0_i32_0 = arith.constant 0 : i32
    %c0_i32_1 = arith.constant 0 : i32
    %c0_i32_2 = arith.constant 0 : i32
    return %c0_i32, %c0_i32_0, %c0_i32_1, %arg0 : i32, i32, i32, i32
  }
  func.func @transform_6(%arg0: i32) -> (i32, i32, i32) {
    %c0_i32 = arith.constant 0 : i32
    %c0_i32_0 = arith.constant 0 : i32
    %c0_i32_1 = arith.constant 0 : i32
    return %c0_i32, %c0_i32_0, %arg0 : i32, i32, i32
  }
  func.func @transform_7(%arg0: i32) -> (i32, i32, i32, i32) {
    %c0_i32 = arith.constant 0 : i32
    %c0_i32_0 = arith.constant 0 : i32
    %c0_i32_1 = arith.constant 0 : i32
    %c0_i32_2 = arith.constant 0 : i32
    return %c0_i32, %c0_i32_0, %c0_i32_1, %arg0 : i32, i32, i32, i32
  }
  func.func @transform_8(%arg0: i32) -> i32 {
    %c0_i32 = arith.constant 0 : i32
    %c0_i32_0 = arith.constant 0 : i32
    return %c0_i32 : i32
  }
}

</mosaic_0001>

<bundles_post_ra>
// kernel: tpu_custom_call.1
= control target key start
LH: loop header
LB: loop body
LE: loop exit
PB: predicated region body
PF: predicated region fallthrough
CT: control target
= control target key end

     0   :  { %13 = vsyncpa [#allocation4], 0  ;;  %s2398_s0 = inlined_call_operand.hbm [shape: f32[2,4,256], index: 0, kind: input, shape index: {}]   ;;  %s2399_s1 = inlined_call_operand.vmem [shape: f32[2,5,256], index: 1, kind: input, shape index: {}]   ;;  %s2400_s2 = inlined_call_operand.vmem [shape: f32[2,4,2,256], index: 2, kind: input, shape index: {}]   ;;  %s2401_s3 = inlined_call_operand.hbm [shape: f32[2,4,256], index: 3, kind: input, shape index: {}]   ;;  %s2402_s4 = inlined_call_operand.hbm [shape: f32[2,4,2,256], index: 4, kind: input, shape index: {}]   ;;  %s2403_s5 = inlined_call_operand.hbm [shape: f32[2,4,2,256], index: 5, kind: input, shape index: {}]   ;;  %s2404_s6 = inlined_call_operand.hbm [shape: f32[2,4,256], index: 6, kind: input, shape index: {}]   ;;  %s2405_s7 = inlined_call_operand.vmem [shape: f32[2,4,2,256], index: 7, kind: input, shape index: {}]   ;;  %s2406_s8 = inlined_call_operand.hbm [shape: f32[8], index: 8, kind: output, shape index: {}]  }
   0x1   :  { %14 = vsyncpa [#allocation7], 0 }
   0x2   :  { %15 = vsyncpa [#allocation10], 0 }
   0x3   :  { %16 = vsyncpa [#allocation5], 0  ;;  %s1541_s27 = smov [#allocation6]  }
   0x4   :  { %s38_s28 = sshll.u32 %s1541_s27, 4  ;;  %s39_s28 = int_to_ptr.vmem [resolvable:$true] %s38_s28 }
   0x5   :  { %s1433_s29 = scalar_lea.vmem %s39_s28, 256  ;;  %p1438_p1 = scmp.lt.s32.totalorder %s39_s28, %s39_s28 }
   0x6   :  { %p1434_p0 = scmp.ne.s32.totalorder %s39_s28, %s1433_s29  ;;  %p1439_p2 = scmp.lt.s32.totalorder %s1433_s29, %s1433_s29 }
   0x8   :  { %p1440_p3 = por %p1439_p2, %p1438_p1 }
   0xa   :  { %p1441_p4 = pnand %p1440_p3, %p1434_p0 }
   0xc   :  { %1444 = shalt.err (!%p1441_p4)
}
   0xd   :  { %s1542_s30 = smov 128   ;;  %s1543_s9 = smov 8  }
   0xe   :  { %44 = dma.hbm_to_vmem [thread:$0]  %s2401_s3, 256, %s39_s28, [#allocation7], %s1542_s30, %s1542_s30, %s1543_s9  }
   0xf   :  { %s1544_s12 = smov [#allocation9]   ;;  %s1545_s14 = smov [#allocation3]  }
  0x10   :  { %s62_s13 = sshll.u32 %s1544_s12, 4  ;;  %s22_s15 = sshll.u32 %s1545_s14, 4  ;;  %s63_s13 = int_to_ptr.vmem [resolvable:$true] %s62_s13  ;;  %s23_s15 = int_to_ptr.vmem [resolvable:$true] %s22_s15 }
  0x11   :  { %s1453_s16 = scalar_lea.vmem %s63_s13, 512  ;;  %p1458_p6 = scmp.lt.s32.totalorder %s63_s13, %s63_s13 }
  0x12   :  { %p1454_p5 = scmp.ne.s32.totalorder %s63_s13, %s1453_s16  ;;  %p1459_p7 = scmp.lt.s32.totalorder %s1453_s16, %s1453_s16 }
  0x14   :  { %p1460_p8 = por %p1459_p7, %p1458_p6 }
  0x16   :  { %p1461_p9 = pnand %p1460_p8, %p1454_p5 }
  0x18   :  { %1464 = shalt.err (!%p1461_p9)
}
  0x19   :  { %s1546_s17 = smov 64   ;;  %s1547_s18 = smov 4  }
  0x1a   :  { %68 = dma.hbm_to_vmem [thread:$0]  %s2403_s5, 512, %s63_s13, [#allocation10], %s1546_s17, %s1546_s17, %s1547_s18  }
  0x1b   :  { %s1473_s3 = scalar_lea.vmem %s23_s15, 256  ;;  %p1478_p11 = scmp.lt.s32.totalorder %s23_s15, %s23_s15 }
  0x1c   :  { %p1474_p10 = scmp.ne.s32.totalorder %s23_s15, %s1473_s3  ;;  %p1479_p12 = scmp.lt.s32.totalorder %s1473_s3, %s1473_s3 }
  0x1e   :  { %p1480_p13 = por %p1479_p12, %p1478_p11 }
  0x20   :  { %p1481_p0 = pnand %p1480_p13, %p1474_p10 }
  0x22   :  { %1484 = shalt.err (!%p1481_p0)
}
  0x23   :  { %28 = dma.hbm_to_vmem [thread:$0]  %s2398_s0, 256, %s23_s15, [#allocation4], %s1542_s30, %s1542_s30, %s1543_s9  }
  0x24   :  { %s1548_s23 = smov [#allocation8]   ;;  %s1549_s25 = smov [#allocation11]  }
  0x25   :  { %s50_s24 = sshll.u32 %s1548_s23, 4  ;;  %s74_s5 = sshll.u32 %s1549_s25, 4  ;;  %s51_s24 = int_to_ptr.vmem [resolvable:$true] %s50_s24  ;;  %s75_s5 = int_to_ptr.vmem [resolvable:$true] %s74_s5 }
  0x26   :  { %s1493_s26 = scalar_lea.vmem %s51_s24, 512  ;;  %p1498_p2 = scmp.lt.s32.totalorder %s51_s24, %s51_s24 }
  0x27   :  { %p1494_p1 = scmp.ne.s32.totalorder %s51_s24, %s1493_s26  ;;  %p1499_p3 = scmp.lt.s32.totalorder %s1493_s26, %s1493_s26 }
  0x29   :  { %p1500_p4 = por %p1499_p3, %p1498_p2 }
  0x2b   :  { %p1501_p5 = pnand %p1500_p4, %p1494_p1 }
  0x2d   :  { %1504 = shalt.err (!%p1501_p5)
}
  0x2e   :  { %56 = dma.hbm_to_vmem [thread:$0]  %s2402_s4, 512, %s51_s24, [#allocation7], %s1546_s17, %s1546_s17, %s1547_s18  }
  0x2f   :  { %s1513_s29 = scalar_lea.vmem %s75_s5, 256  ;;  %p1518_p7 = scmp.lt.s32.totalorder %s75_s5, %s75_s5 }
  0x30   :  { %p1514_p6 = scmp.ne.s32.totalorder %s75_s5, %s1513_s29  ;;  %p1519_p8 = scmp.lt.s32.totalorder %s1513_s29, %s1513_s29 }
  0x32   :  { %p1520_p9 = por %p1519_p8, %p1518_p7 }
  0x34   :  { %p1521_p10 = pnand %p1520_p9, %p1514_p6 }
  0x36   :  { %1524 = shalt.err (!%p1521_p10)
}
  0x37   :  { %80 = dma.hbm_to_vmem [thread:$0]  %s2404_s6, 256, %s75_s5, [#allocation10], %s1542_s30, %s1542_s30, %s1543_s9  }
  0x38   :  { %1533 = dma.done.wait [#allocation4], 256  }
  0x39   :  { %1534 = vsyncadd [#allocation4], 4294967040 }
  0x3a   :  { %1535 = dma.done.wait [#allocation7], 768  }
  0x3b   :  { %1536 = vsyncadd [#allocation7], 4294966528 }
  0x3c   :  { %1537 = dma.done.wait [#allocation10], 768  }
  0x3d   :  { %1538 = vsyncadd [#allocation10], 4294966528  ;;  %vm124_vm0 = vcmask 1044480   ;;  %v1626_v0 = vld [vmem:[%s2399_s1] sm:$0x1f]  ;;  %v1649_v12 = vld [vmem:[#allocation3 + $0x8] sm:$0xff]  ;;  %v326_v14 = vlaneseq }
  0x3e   :  { %v1631_v1 = vld [vmem:[%s2399_s1 + $0x8] sm:$0x1f]  ;;  %v1636_v2 = vld [vmem:[%s2399_s1 + $0x10] sm:$0x1f]  ;;  %v1641_v3 = vld [vmem:[%s2399_s1 + $0x18] sm:$0x1f] }
  0x3f   :  { %v125_v4 = vsel %vm124_vm0, %v1626_v0, 0.0  ;;  %v132_v5 = vsel %vm124_vm0, %v1631_v1, 0.0  ;;  %v139_v6 = vsel %vm124_vm0, %v1636_v2, 0.0  ;;  %v146_v10 = vsel %vm124_vm0, %v1641_v3, 0.0  ;;  %v1647_v11 = vld [vmem:[#allocation3] sm:$0xff]  ;;  %s1552_s19 = smov 0.0  }
  0x40   :  { %v126_v7 = vrot.slane %v125_v4, 4  ;;  %v133_v8 = vrot.slane %v132_v5, 4  ;;  %v140_v9 = vrot.slane %v139_v6, 4  ;;  %v147_v13 = vrot.slane %v146_v10, 4  ;;  %v283_v49 = vld [vmem:[%s2400_s2] sm:$0xf] }
  0x41   :  { %vm242_vm1 = vcmask 1040384   ;;  %v175_v19 = vand.u32 2147483647, %v1647_v11  ;;  %v176_v20 = vand.u32 2147483647, %v1649_v12  ;;  %vm2409_vm2 = vcmask 1043456  }
  0x42   :  { %v127_v15 = vadd.f32 %v126_v7, %v125_v4  ;;  %v134_v16 = vadd.f32 %v133_v8, %v132_v5  ;;  %v141_v17 = vadd.f32 %v140_v9, %v139_v6  ;;  %v148_v18 = vadd.f32 %v147_v13, %v146_v10  ;;  %v284_v51 = vld [vmem:[%s2400_s2 + $0x4] sm:$0xf]  ;;  %v291_v55 = vld [vmem:[#allocation8] sm:$0xf]  ;;  %1278 = sst [smem:[#allocation12 + $0x5]] %s1552_s19  ;;  %s1553_s21 = smov [#allocation12]  }
  0x43   :  { %v1550_v24 = vmov 1983009808   ;;  %v177_v27 = vsub.f32 0.0, %v175_v19  ;;  %v178_v28 = vsub.f32 0.0, %v176_v20  ;;  %v327_v29 = vshrl.u32 %v326_v14, 7  ;;  %1281 = sst [smem:[#allocation12 + $0x6]] %s1552_s19 }
  0x44   :  { %v128_v21 = vrot.slane %v127_v15, 2  ;;  %v135_v22 = vrot.slane %v134_v16, 2  ;;  %v142_v23 = vrot.slane %v141_v17, 2  ;;  %v324_v25 = vunpack.c.l.s4 %v1550_v24  ;;  %v292_v60 = vld [vmem:[#allocation8 + $0x4] sm:$0xf]  ;;  %1284 = sst [smem:[#allocation12 + $0x7]] %s1552_s19 }
  0x45   :  { %v149_v26 = vrot.slane %v148_v18, 2  ;;  %vm2411_vm3 = vcmp.gt.f32.partialorder %v1626_v0, 0.5  ;;  %v179_v34 = vmul.f32 1.442695, %v177_v27  ;;  %v181_v35 = vmul.f32 1.442695, %v178_v28 }
  0x46   :  { %v129_v30 = vadd.f32 %v128_v21, %v127_v15  ;;  %v136_v31 = vadd.f32 %v135_v22, %v134_v16  ;;  %v143_v32 = vadd.f32 %v142_v23, %v141_v17  ;;  %vm2408_vm4 = vcmp.gt.f32.partialorder %v1631_v1, 0.5  ;;  %v293_v19 = vld [vmem:[#allocation8 + $0x8] sm:$0xf]  ;;  %v286_v20 = vld [vmem:[%s2400_s2 + $0xc] sm:$0xf] }
  0x47   :  { %v150_v33 = vadd.f32 %v149_v26, %v148_v18  ;;  %vm2410_vm5 = vcmp.gt.f32.partialorder %v1636_v2, 0.5  ;;  %1345 = vpow2.f32 %v179_v34  ;;  %vm2407_vm6 = vcmp.gt.f32.partialorder %v1641_v3, 0.5  ;;  %v285_v18 = vld [vmem:[%s2400_s2 + $0x8] sm:$0xf]  ;;  %v287_v21 = vld [vmem:[%s2400_s2 + $0x10] sm:$0xf] }
  0x48   :  { %v130_v36 = vrot.slane %v129_v30, 1  ;;  %v137_v37 = vrot.slane %v136_v31, 1  ;;  %v144_v38 = vrot.slane %v143_v32, 1  ;;  %v1551_v40 = vmov 0.0   ;;  %v294_v22 = vld [vmem:[#allocation8 + $0xc] sm:$0xf] }
  0x49   :  { %v151_v39 = vrot.slane %v150_v33, 1  ;;  %v1305_v41 = vsel %vm2411_vm3, 1.0, %v1551_v40  ;;  %1347 = vpow2.f32 %v181_v35  ;;  %v1306_v46 = vsel %vm2408_vm4, 1.0, %v1551_v40  ;;  %v288_v26 = vld [vmem:[%s2400_s2 + $0x14] sm:$0xf] }
  0x4a   :  { %v1659_v42 = vadd.f32 %v130_v36, %v129_v30  ;;  %v1661_v43 = vadd.f32 %v137_v37, %v136_v31  ;;  %v1663_v44 = vadd.f32 %v144_v38, %v143_v32  ;;  %v1307_v47 = vsel %vm2410_vm5, 1.0, %v1551_v40  ;;  %v289_v27 = vld [vmem:[%s2400_s2 + $0x18] sm:$0xf]  ;;  %v295_v28 = vld [vmem:[#allocation8 + $0x10] sm:$0xf] }
  0x4b   :  { %v1665_v45 = vadd.f32 %v151_v39, %v150_v33  ;;  %v1308_v48 = vsel %vm2407_vm6, 1.0, %v1551_v40  ;;  %v267_v50 = vsel %vm2409_vm2, %v1305_v41, 0.0  ;;  %v268_v62 = vsel %vm2409_vm2, %v1306_v46, 0.0  ;;  %v296_v32 = vld [vmem:[#allocation8 + $0x14] sm:$0xf] }
  0x4c   :  { %vm153_vm7 = vcmp.gt.f32.partialorder %v1659_v42, 0.5  ;;  %vm154_vm8 = vcmp.gt.f32.partialorder %v1661_v43, 0.5  ;;  %vm155_vm9 = vcmp.gt.f32.partialorder %v1663_v44, 0.5  ;;  %v270_v63 = vsel %vm2409_vm2, %v1307_v47, 0.0  ;;  %v297_v33 = vld [vmem:[#allocation8 + $0x18] sm:$0xf] }
  0x4d   :  { %vm156_vm10 = vcmp.gt.f32.partialorder %v1665_v45, 0.5  ;;  %v1301_v52 = vsel %vm153_vm7, 1.0, %v1551_v40  ;;  %v1302_v53 = vsel %vm154_vm8, 1.0, %v1551_v40  ;;  %v1303_v54 = vsel %vm155_vm9, 1.0, %v1551_v40  ;;  %v290_v38 = vld [vmem:[%s2400_s2 + $0x1c] sm:$0xf] }
  0x4e   :  { %v1304_v56 = vsel %vm156_vm10, 1.0, %v1551_v40  ;;  %v243_v57 = vsel %vm242_vm1, %v1301_v52, 0.0  ;;  %v244_v58 = vsel %vm242_vm1, %v1302_v53, 0.0  ;;  %v246_v59 = vsel %vm242_vm1, %v1303_v54, 0.0  ;;  %v298_v39 = vld [vmem:[#allocation8 + $0x1c] sm:$0xf] }
  0x4f   :  { %v245_v61 = vadd.f32 %v244_v58, %v243_v57  ;;  %v325_v4 = vunpack.c.0.s8 %v324_v25  ;;  %v248_v5 = vsel %vm242_vm1, %v1304_v56, 0.0  ;;  %v269_v6 = vadd.f32 %v268_v62, %v267_v50 }
  0x50   :  { %v299_v7 = vsub.f32 %v283_v49, %v291_v55  ;;  %v272_v9 = vsel %vm2409_vm2, %v1308_v48, 0.0  ;;  %v300_v10 = vsub.f32 %v284_v51, %v292_v60  ;;  %v167_v30 = vcombine.low %v1626_v0, %v1631_v1 }
  0x51   :  { %v247_v8 = vadd.f32 %v246_v59, %v245_v61  ;;  %v271_v13 = vadd.f32 %v270_v63, %v269_v6  ;;  %v1699_v16 = vsub.s32 %v325_v4, %v327_v29  ;;  %v301_v34 = vsub.f32 %v285_v18, %v293_v19 }
  0x52   :  { %v307_v15 = vmul.f32 %v299_v7, %v299_v7  ;;  %v308_v23 = vmul.f32 %v300_v10, %v300_v10  ;;  %v168_v35 = vcombine.low %v1636_v2, %v1641_v3  ;;  %v302_v37 = vsub.f32 %v286_v20, %v294_v22 }
  0x53   :  { %v249_v14 = vadd.f32 %v248_v5, %v247_v8  ;;  %v273_v17 = vadd.f32 %v272_v9, %v271_v13  ;;  %v303_v40 = vsub.f32 %v287_v21, %v295_v28  ;;  %v304_v47 = vsub.f32 %v288_v26, %v296_v32 }
  0x54   :  { %v329_v24 = vrot.slane %v307_v15, %v1699_v16  ;;  %v1711_v25 = vpop.eup %1345  ;;  %v337_v46 = vrot.slane %v308_v23, %v1699_v16  ;;  %v305_v48 = vsub.f32 %v289_v27, %v297_v33  ;;  %vm2412_vm11 = vcmask 1041408  }
  0x55   :  { %250 = vadd.xlane.f32.xlu0 %v249_v14  ;;  %274 = vadd.xlane.f32.xlu1 %v273_v17  ;;  %v183_v31 = vadd.f32 1.0, %v1711_v25  ;;  %v161_v49 = vmax.f32 %v1647_v11, 0.0  ;;  %v162_v50 = vmax.f32 %v1649_v12, 0.0  ;;  %v171_v51 = vmul.f32 %v167_v30, %v1647_v11 }
  0x56   :  { %v1719_v29 = vpop.eup %1347  ;;  %v330_v41 = vcombine.high %v329_v24, %v329_v24  ;;  %v309_v52 = vmul.f32 %v301_v34, %v301_v34  ;;  %v172_v53 = vmul.f32 %v168_v35, %v1649_v12  ;;  %v306_v54 = vsub.f32 %v290_v38, %v298_v39 }
  0x57   :  { %v192_v36 = vadd.f32 1.0, %v1719_v29  ;;  %1349 = vlog2.f32 %v183_v31  ;;  %v310_v55 = vmul.f32 %v302_v37, %v302_v37  ;;  %v404_v56 = vsel %vm2412_vm11, %v329_v24, 0.0 }
  0x58   :  { %v186_v57 = vmul.f32 -0.5, %v1711_v25  ;;  %v311_v58 = vmul.f32 %v303_v40, %v303_v40  ;;  %v338_v59 = vcombine.high %v337_v46, %v337_v46  ;;  %v411_v60 = vsel %vm2412_vm11, %v330_v41, 0.0 }
  0x59   :  { %1351 = vlog2.f32 %v192_v36  ;;  %v195_v61 = vmul.f32 -0.5, %v1719_v29  ;;  %v312_v62 = vmul.f32 %v304_v47, %v304_v47  ;;  %v313_v63 = vmul.f32 %v305_v48, %v305_v48 }
  0x5a   :  { %v418_v4 = vsel %vm2412_vm11, %v337_v46, 0.0  ;;  %v173_v11 = vsub.f32 %v161_v49, %v171_v51  ;;  %v189_v5 = vand.u32 2147483647, %v1711_v25  ;;  %v345_v12 = vrot.slane %v309_v52, %v1699_v16 }
  0x5b   :  { %v405_v6 = vrot.slane %v404_v56, 4  ;;  %v198_v7 = vand.u32 2147483647, %v1719_v29  ;;  %v314_v8 = vmul.f32 %v306_v54, %v306_v54  ;;  %v353_v9 = vrot.slane %v310_v55, %v1699_v16 }
  0x5c   :  { %v412_v10 = vrot.slane %v411_v60, 4  ;;  %v187_v13 = vadd.f32 1.0, %v186_v57  ;;  %v361_v14 = vrot.slane %v311_v58, %v1699_v16  ;;  %v419_v15 = vrot.slane %v418_v4, 4 }
  0x5d   :  { %v425_v17 = vsel %vm2412_vm11, %v338_v59, 0.0  ;;  %v196_v18 = vadd.f32 1.0, %v195_v61  ;;  %v1747_v19 = vrot.slane %v312_v62, %v1699_v16  ;;  %v1750_v20 = vrot.slane %v313_v63, %v1699_v16 }
  0x5e   :  { %v432_v21 = vsel %vm2412_vm11, %v345_v12, 0.0  ;;  %v174_v22 = vsub.f32 %v162_v50, %v172_v53  ;;  %vm1753_vm12 = vcmp.lt.f32.partialorder %v189_v5, 0.0004427343  ;;  %v346_v24 = vcombine.high %v345_v12, %v345_v12 }
  0x5f   :  { %v406_v26 = vadd.f32 %v405_v6, %v404_v56  ;;  %vm1757_vm13 = vcmp.lt.f32.partialorder %v198_v7, 0.0004427343  ;;  %v354_v28 = vcombine.high %v353_v9, %v353_v9  ;;  %v413_v30 = vadd.f32 %v412_v10, %v411_v60 }
  0x60   :  { %v426_v31 = vrot.slane %v425_v17, 4  ;;  %v188_v32 = vmul.f32 %v1711_v25, %v187_v13  ;;  %v1763_v33 = vrot.slane %v314_v8, %v1699_v16  ;;  %v420_v34 = vadd.f32 %v419_v15, %v418_v4 }
  0x61   :  { %v433_v35 = vrot.slane %v432_v21, 4  ;;  %v197_v37 = vmul.f32 %v1719_v29, %v196_v18  ;;  %v362_v38 = vcombine.high %v361_v14, %v361_v14  ;;  %v370_v39 = vcombine.high %v1747_v19, %v1747_v19 }
  0x62   :  { %v378_v40 = vcombine.high %v1750_v20, %v1750_v20  ;;  %v407_v47 = vrot.slane %v406_v26, 2  ;;  %v439_v25 = vsel %vm2412_vm11, %v346_v24, 0.0  ;;  %v446_v48 = vsel %vm2412_vm11, %v353_v9, 0.0 }
  0x63   :  { %v414_v50 = vrot.slane %v413_v30, 2  ;;  %v427_v51 = vadd.f32 %v426_v31, %v425_v17  ;;  %v453_v52 = vsel %vm2412_vm11, %v354_v28, 0.0  ;;  %v386_v53 = vcombine.high %v1763_v33, %v1763_v33 }
  0x64   :  { %v1350_v36 = vpop.eup %1349  ;;  %v421_v54 = vrot.slane %v420_v34, 2  ;;  %v434_v55 = vadd.f32 %v433_v35, %v432_v21  ;;  %v440_v58 = vrot.slane %v439_v25, 4  ;;  %v447_v59 = vrot.slane %v446_v48, 4 }
  0x65   :  { %v185_v46 = vmul.f32 0.6931472, %v1350_v36  ;;  %v408_v61 = vadd.f32 %v407_v47, %v406_v26  ;;  %v454_v62 = vrot.slane %v453_v52, 4  ;;  %v460_v63 = vsel %vm2412_vm11, %v361_v14, 0.0 }
  0x66   :  { %v1352_v41 = vpop.eup %1351  ;;  %v415_v12 = vadd.f32 %v414_v50, %v413_v30  ;;  %v428_v6 = vrot.slane %v427_v51, 2  ;;  %v441_v15 = vadd.f32 %v440_v58, %v439_v25  ;;  %v461_v14 = vrot.slane %v460_v63, 4 }
  0x67   :  { %v194_v49 = vmul.f32 0.6931472, %v1352_v41  ;;  %v191_v29 = vsel %vm1753_vm12, %v188_v32, %v185_v46  ;;  %v467_v18 = vsel %vm2412_vm11, %v362_v38, 0.0  ;;  %v474_v44 = vsel %vm2412_vm11, %v1747_v19, 0.0 }
  0x68   :  { %v201_v57 = vadd.f32 %v191_v29, %v173_v11  ;;  %v435_v11 = vrot.slane %v434_v55, 2  ;;  %v448_v23 = vadd.f32 %v447_v59, %v446_v48  ;;  %v468_v43 = vrot.slane %v467_v18, 4 }
  0x69   :  { %v200_v56 = vsel %vm1757_vm13, %v197_v37, %v194_v49  ;;  %v475_v24 = vrot.slane %v474_v44, 4  ;;  %v481_v26 = vsel %vm2412_vm11, %v370_v39, 0.0  ;;  %v488_v27 = vsel %vm2412_vm11, %v1750_v20, 0.0 }
  0x6a   :  { %v202_v60 = vadd.f32 %v200_v56, %v174_v22  ;;  %v213_v4 = vcombine.high %v201_v57, %v201_v57  ;;  %v217_v5 = vsel %vm153_vm7, %v201_v57, 0.0  ;;  %v495_v45 = vsel %vm2412_vm11, %v378_v40, 0.0 }
  0x6b   :  { %v222_v9 = vsel %vm2409_vm2, %v217_v5, 0.0  ;;  %v422_v30 = vadd.f32 %v421_v54, %v420_v34  ;;  %v455_v31 = vadd.f32 %v454_v62, %v453_v52  ;;  %v482_v32 = vrot.slane %v481_v26, 4 }
  0x6c   :  { %v214_v7 = vcombine.high %v202_v60, %v202_v60  ;;  %v219_v8 = vsel %vm155_vm9, %v202_v60, 0.0  ;;  %v218_v10 = vsel %vm154_vm8, %v213_v4, 0.0  ;;  %v409_v35 = vrot.slane %v408_v61, 1 }
  0x6d   :  { %v225_v13 = vsel %vm2409_vm2, %v219_v8, 0.0  ;;  %v223_v17 = vsel %vm2409_vm2, %v218_v10, 0.0  ;;  %v462_v36 = vadd.f32 %v461_v14, %v460_v63  ;;  %v489_v19 = vrot.slane %v488_v27, 4 }
  0x6e   :  { %v220_v42 = vsel %vm156_vm10, %v214_v7, 0.0  ;;  %v224_v21 = vadd.f32 %v223_v17, %v222_v9  ;;  %v502_v37 = vsel %vm2412_vm11, %v1763_v33, 0.0  ;;  %v442_v41 = vrot.slane %v441_v15, 2 }
  0x6f   :  { %v227_v22 = vsel %vm2409_vm2, %v220_v42, 0.0  ;;  %v469_v46 = vadd.f32 %v468_v43, %v467_v18  ;;  %v496_v47 = vrot.slane %v495_v45, 4  ;;  %v416_v39 = vrot.slane %v415_v12, 1 }
  0x70   :  { %v226_v28 = vadd.f32 %v225_v13, %v224_v21  ;;  %v449_v25 = vrot.slane %v448_v23, 2  ;;  %v476_v48 = vadd.f32 %v475_v24, %v474_v44  ;;  %v503_v20 = vrot.slane %v502_v37, 4 }
  0x71   :  { %v429_v40 = vadd.f32 %v428_v6, %v427_v51  ;;  %v456_v49 = vrot.slane %v455_v31, 2  ;;  %v483_v34 = vadd.f32 %v482_v32, %v481_v26  ;;  %v509_v50 = vsel %vm2412_vm11, %v386_v53, 0.0 }
  0x72   :  { %v228_v38 = vadd.f32 %v227_v22, %v226_v28  ;;  %v1802_v52 = vadd.f32 %v409_v35, %v408_v61  ;;  %v436_v29 = vadd.f32 %v435_v11, %v434_v55  ;;  %v463_v54 = vrot.slane %v462_v36, 2 }
  0x73   :  { %v490_v56 = vadd.f32 %v489_v19, %v488_v27  ;;  %v443_v33 = vadd.f32 %v442_v41, %v441_v15  ;;  %v470_v57 = vrot.slane %v469_v46, 2  ;;  %v497_v58 = vadd.f32 %v496_v47, %v495_v45 }
  0x74   :  { %229 = vadd.xlane.f32.xlu0 %v228_v38  ;;  %v510_v59 = vrot.slane %v509_v50, 4  ;;  %v423_v60 = vrot.slane %v422_v30, 1  ;;  %v450_v62 = vadd.f32 %v449_v25, %v448_v23  ;;  %v477_v63 = vrot.slane %v476_v48, 2 }
  0x75   :  { %v504_v4 = vadd.f32 %v503_v20, %v502_v37  ;;  %v430_v5 = vrot.slane %v429_v40, 1  ;;  %v457_v7 = vadd.f32 %v456_v49, %v455_v31  ;;  %v484_v51 = vrot.slane %v483_v34, 2 }
  0x76   :  { %v511_v6 = vadd.f32 %v510_v59, %v509_v50  ;;  %v1804_v8 = vadd.f32 %v416_v39, %v415_v12  ;;  %v437_v53 = vrot.slane %v436_v29, 1  ;;  %v464_v61 = vadd.f32 %v463_v54, %v462_v36 }
  0x77   :  { %v491_v9 = vrot.slane %v490_v56, 2  ;;  %v444_v55 = vrot.slane %v443_v33, 1  ;;  %v471_v11 = vadd.f32 %v470_v57, %v469_v46  ;;  %v498_v10 = vrot.slane %v497_v58, 2 }
  0x78   :  { %1353 = vrsqrt.f32 %v1802_v52  ;;  %v1807_v13 = vadd.f32 %v423_v60, %v422_v30  ;;  %v451_v15 = vrot.slane %v450_v62, 1  ;;  %v478_v14 = vadd.f32 %v477_v63, %v476_v48  ;;  %v1871_v63 = vld [vmem:[#allocation6] sm:$0xff] }
  0x79   :  { %v505_v42 = vrot.slane %v504_v4, 2  ;;  %v1809_v17 = vadd.f32 %v430_v5, %v429_v40  ;;  %v458_v18 = vrot.slane %v457_v7, 1  ;;  %v485_v44 = vadd.f32 %v484_v51, %v483_v34 }
  0x7a   :  { %v512_v21 = vrot.slane %v511_v6, 2  ;;  %v1811_v12 = vadd.f32 %v437_v53, %v436_v29  ;;  %v465_v22 = vrot.slane %v464_v61, 1  ;;  %v492_v23 = vadd.f32 %v491_v9, %v490_v56 }
  0x7b   :  { %v1813_v43 = vadd.f32 %v444_v55, %v443_v33  ;;  %v472_v24 = vrot.slane %v471_v11, 1  ;;  %v499_v26 = vadd.f32 %v498_v10, %v497_v58  ;;  %1355 = vrsqrt.f32 %v1804_v8 }
  0x7c   :  { %v1816_v27 = vadd.f32 %v451_v15, %v450_v62  ;;  %v479_v45 = vrot.slane %v478_v14, 1  ;;  %v506_v28 = vadd.f32 %v505_v42, %v504_v4  ;;  %1357 = vrsqrt.f32 %v1807_v13 }
  0x7d   :  { %v1819_v30 = vadd.f32 %v458_v18, %v457_v7  ;;  %v486_v31 = vrot.slane %v485_v44, 1  ;;  %v513_v32 = vadd.f32 %v512_v21, %v511_v6  ;;  %1359 = vrsqrt.f32 %v1809_v17  ;;  %v1877_v6 = vld [vmem:[#allocation6 + $0x8] sm:$0xff] }
  0x7e   :  { %v1822_v35 = vadd.f32 %v465_v22, %v464_v61  ;;  %v493_v36 = vrot.slane %v492_v23, 1  ;;  %1361 = vrsqrt.f32 %v1811_v12  ;;  %v1825_v19 = vadd.f32 %v472_v24, %v471_v11 }
  0x7f   :  { %v500_v37 = vrot.slane %v499_v26, 1  ;;  %1363 = vrsqrt.f32 %v1813_v43  ;;  %v1828_v38 = vadd.f32 %v479_v45, %v478_v14  ;;  %v507_v41 = vrot.slane %v506_v28, 1 }
  0x80   :  { %1365 = vrsqrt.f32 %v1816_v27  ;;  %v1831_v46 = vadd.f32 %v486_v31, %v485_v44  ;;  %v514_v47 = vrot.slane %v513_v32, 1  ;;  %v1834_v39 = vadd.f32 %v493_v36, %v492_v23 }
  0x81   :  { %1367 = vrsqrt.f32 %v1819_v30  ;;  %v1837_v25 = vadd.f32 %v500_v37, %v499_v26  ;;  %v1840_v20 = vadd.f32 %v507_v41, %v506_v28  ;;  %vm518_vm14 = vcmp.eq.f32.partialorder %v1802_v52, inf }
  0x82   :  { %1369 = vrsqrt.f32 %v1822_v35  ;;  %v1843_v40 = vadd.f32 %v514_v47, %v513_v32  ;;  %vm520_vm15 = vcmp.eq.f32.partialorder %v1802_v52, 0.0  ;;  %v521_v34 = vand.u32 2147483648, %v1802_v52 }
  0x83   :  { %1371 = vrsqrt.f32 %v1825_v19  ;;  %vm525_vm0 = vcmp.eq.f32.partialorder %v1804_v8, inf  ;;  %vm527_vm1 = vcmp.eq.f32.partialorder %v1804_v8, 0.0  ;;  %v528_v29 = vand.u32 2147483648, %v1804_v8 }
  0x84   :  { %1373 = vrsqrt.f32 %v1828_v38  ;;  %vm532_vm7 = vcmp.eq.f32.partialorder %v1807_v13, inf  ;;  %vm534_vm8 = vcmp.eq.f32.partialorder %v1807_v13, 0.0  ;;  %v535_v56 = vand.u32 2147483648, %v1807_v13 }
  0x85   :  { %v1354_v48 = vpop.eup %1353  ;;  %1375 = vrsqrt.f32 %v1831_v46  ;;  %vm539_vm9 = vcmp.eq.f32.partialorder %v1809_v17, inf  ;;  %vm541_vm10 = vcmp.eq.f32.partialorder %v1809_v17, 0.0  ;;  %v542_v57 = vand.u32 2147483648, %v1809_v17 }
  0x86   :  { %1377 = vrsqrt.f32 %v1834_v39  ;;  %v517_v49 = vmul.f32 %v1354_v48, %v1802_v52  ;;  %vm546_vm12 = vcmp.eq.f32.partialorder %v1811_v12, inf  ;;  %v549_v58 = vand.u32 2147483648, %v1811_v12 }
  0x87   :  { %1379 = vrsqrt.f32 %v1837_v25  ;;  %vm553_vm13 = vcmp.eq.f32.partialorder %v1813_v43, inf  ;;  %v556_v62 = vand.u32 2147483648, %v1813_v43  ;;  %vm560_vm6 = vcmp.eq.f32.partialorder %v1816_v27, inf }
  0x88   :  { %v1356_v50 = vpop.eup %1355  ;;  %1381 = vrsqrt.f32 %v1840_v20  ;;  %v519_v60 = vsel %vm518_vm14, %v1802_v52, %v517_v49  ;;  %v563_v7 = vand.u32 2147483648, %v1816_v27  ;;  %v570_v51 = vand.u32 2147483648, %v1819_v30 }
  0x89   :  { %v1358_v54 = vpop.eup %1357  ;;  %1383 = vrsqrt.f32 %v1843_v40  ;;  %v524_v5 = vmul.f32 %v1356_v50, %v1804_v8  ;;  %v577_v9 = vand.u32 2147483648, %v1822_v35  ;;  %v584_v55 = vand.u32 2147483648, %v1825_v19 }
  0x8a   :  { %v1360_v33 = vpop.eup %1359  ;;  %v531_v61 = vmul.f32 %v1358_v54, %v1807_v13  ;;  %v1886_v10 = vsel %vm520_vm15, %v521_v34, %v519_v60  ;;  %vm555_vm5 = vcmp.eq.f32.partialorder %v1813_v43, 0.0  ;;  %vm562_vm3 = vcmp.eq.f32.partialorder %v1816_v27, 0.0 }
  0x8b   :  { %v1362_v59 = vpop.eup %1361  ;;  %v538_v15 = vmul.f32 %v1360_v33, %v1809_v17  ;;  %v591_v14 = vand.u32 2147483648, %v1828_v38  ;;  %v632_v42 = vsub.f32 0.0, %v1871_v63  ;;  %vm576_vm2 = vcmp.eq.f32.partialorder %v1822_v35, 0.0  ;;  %v764_v33 = vld [vmem:[#allocation9] sm:$0xf] }
  0x8c   :  { %v1364_v4 = vpop.eup %1363  ;;  %vm588_vm15 = vcmp.eq.f32.partialorder %v1828_v38, inf  ;;  %v598_v52 = vand.u32 2147483648, %v1831_v46  ;;  %v605_v44 = vand.u32 2147483648, %v1834_v39  ;;  %v633_v21 = vsub.f32 0.0, %v1877_v6 }
  0x8d   :  { %v1366_v53 = vpop.eup %1365  ;;  %v526_v23 = vsel %vm525_vm0, %v1804_v8, %v524_v5  ;;  %vm602_vm11 = vcmp.eq.f32.partialorder %v1834_v39, inf  ;;  %v612_v24 = vand.u32 2147483648, %v1837_v25  ;;  %v634_v26 = vmul.f32 1.442695, %v632_v42 }
  0x8e   :  { %v1368_v11 = vpop.eup %1367  ;;  %v533_v28 = vsel %vm532_vm7, %v1807_v13, %v531_v61  ;;  %v545_v31 = vmul.f32 %v1362_v59, %v1811_v12  ;;  %v552_v32 = vmul.f32 %v1364_v4, %v1813_v43  ;;  %vm583_vm4 = vcmp.eq.f32.partialorder %v1825_v19, 0.0 }
  0x8f   :  { %v1370_v18 = vpop.eup %1369  ;;  %v636_v36 = vmul.f32 1.442695, %v633_v21  ;;  %v540_v41 = vsel %vm539_vm9, %v1809_v17, %v538_v15  ;;  %v559_v47 = vmul.f32 %v1366_v53, %v1816_v27  ;;  %v566_v48 = vmul.f32 %v1368_v11, %v1819_v30 }
  0x90   :  { %v1372_v22 = vpop.eup %1371  ;;  %1385 = vpow2.f32 %v634_v26  ;;  %v1925_v34 = vsel %vm527_vm1, %v528_v29, %v526_v23  ;;  %v573_v50 = vmul.f32 %v1370_v18, %v1822_v35  ;;  %vm604_vm9 = vcmp.eq.f32.partialorder %v1834_v39, 0.0  ;;  %v772_v29 = vld [vmem:[%s2405_s7] sm:$0xf]  ;;  %v766_v23 = vld [vmem:[#allocation9 + $0x8] sm:$0xf] }
  0x91   :  { %v1374_v45 = vpop.eup %1373  ;;  %vm611_vm0 = vcmp.eq.f32.partialorder %v1837_v25, 0.0  ;;  %v619_v54 = vand.u32 2147483648, %v1840_v20  ;;  %1387 = vpow2.f32 %v636_v36  ;;  %v1935_v60 = vsel %vm534_vm8, %v535_v56, %v533_v28  ;;  %v767_v36 = vld [vmem:[#allocation9 + $0xc] sm:$0xf] }
  0x92   :  { %v1376_v37 = vpop.eup %1375  ;;  %vm618_vm1 = vcmp.eq.f32.partialorder %v1840_v20, 0.0  ;;  %vm623_vm14 = vcmp.eq.f32.partialorder %v1843_v40, inf  ;;  %vm625_vm7 = vcmp.eq.f32.partialorder %v1843_v40, 0.0  ;;  %v626_v8 = vand.u32 2147483648, %v1843_v40 }
  0x93   :  { %v1378_v49 = vpop.eup %1377  ;;  %v1948_v13 = vsel %vm541_vm10, %v542_v57, %v540_v41  ;;  %v547_v56 = vsel %vm546_vm12, %v1811_v12, %v545_v31  ;;  %v554_v5 = vsel %vm553_vm13, %v1813_v43, %v552_v32  ;;  %v580_v53 = vmul.f32 %v1372_v22, %v1825_v19  ;;  %v765_v22 = vld [vmem:[#allocation9 + $0x4] sm:$0xf] }
  0x94   :  { %v1380_v59 = vpop.eup %1379  ;;  %v561_v11 = vsel %vm560_vm6, %v1816_v27, %v559_v47  ;;  %vm2423_vm8 = vcmp.eq.f32.partialorder %v1819_v30, inf  ;;  %v587_v57 = vmul.f32 %v1374_v45, %v1828_v38  ;;  %v594_v15 = vmul.f32 %v1376_v37, %v1831_v46  ;;  %v773_v37 = vld [vmem:[%s2405_s7 + $0x4] sm:$0xf]  ;;  %v768_v47 = vld [vmem:[#allocation9 + $0x10] sm:$0xf] }
  0x95   :  { %v1382_v4 = vpop.eup %1381  ;;  %v568_v17 = vsel %vm2423_vm8, %v1819_v30, %v566_v48  ;;  %vm2424_vm10 = vcmp.eq.f32.partialorder %v1822_v35, inf  ;;  %v601_v18 = vmul.f32 %v1378_v49, %v1834_v39  ;;  %v608_v21 = vmul.f32 %v1380_v59, %v1837_v25  ;;  %v774_v48 = vld [vmem:[%s2405_s7 + $0x8] sm:$0xf]  ;;  %v775_v49 = vld [vmem:[%s2405_s7 + $0xc] sm:$0xf] }
  0x96   :  { %v1384_v61 = vpop.eup %1383  ;;  %v575_v42 = vsel %vm2424_vm10, %v1822_v35, %v573_v50  ;;  %v780_v26 = vsub.f32 %v764_v33, %v772_v29  ;;  %vm2425_vm6 = vcmp.eq.f32.partialorder %v1811_v12, 0.0  ;;  %v615_v45 = vmul.f32 %v1382_v4, %v1840_v20  ;;  %v777_v50 = vld [vmem:[%s2405_s7 + $0x14] sm:$0xf]  ;;  %v778_v33 = vld [vmem:[%s2405_s7 + $0x18] sm:$0xf] }
  0x97   :  { %v1974_v28 = vsel %vm2425_vm6, %v549_v58, %v547_v56  ;;  %v622_v31 = vmul.f32 %v1384_v61, %v1843_v40  ;;  %v1979_v32 = vadd.f32 0.694, %v1871_v63  ;;  %v557_v41 = vsel %vm555_vm5, %v556_v62, %v554_v5 }
  0x98   :  { %v564_v12 = vsel %vm562_vm3, %v563_v7, %v561_v11  ;;  %vm2426_vm12 = vcmp.eq.f32.partialorder %v1825_v19, inf  ;;  %v1996_v63 = vadd.f32 0.694, %v1877_v6  ;;  %vm2427_vm5 = vcmp.eq.f32.partialorder %v1819_v30, 0.0  ;;  %v769_v6 = vld [vmem:[#allocation9 + $0x14] sm:$0xf] }
  0x99   :  { %v582_v58 = vsel %vm2426_vm12, %v1825_v19, %v580_v53  ;;  %v571_v43 = vsel %vm2427_vm5, %v570_v51, %v568_v17  ;;  %v578_v27 = vsel %vm576_vm2, %v577_v9, %v575_v42  ;;  %v589_v62 = vsel %vm588_vm15, %v1828_v38, %v587_v57  ;;  %v776_v30 = vld [vmem:[%s2405_s7 + $0x10] sm:$0xf]  ;;  %v770_v9 = vld [vmem:[#allocation9 + $0x18] sm:$0xf] }
  0x9a   :  { %vm2428_vm3 = vcmp.eq.f32.partialorder %v1831_v46, inf  ;;  %v603_v35 = vsel %vm602_vm11, %v1834_v39, %v601_v18  ;;  %vm2429_vm2 = vcmp.eq.f32.partialorder %v1837_v25, inf  ;;  %v781_v59 = vsub.f32 %v765_v22, %v773_v37 }
  0x9b   :  { %v596_v7 = vsel %vm2428_vm3, %v1831_v46, %v594_v15  ;;  %v610_v51 = vsel %vm2429_vm2, %v1837_v25, %v608_v21  ;;  %v788_v29 = vmul.f32 %v780_v26, %v780_v26  ;;  %v585_v4 = vsel %vm583_vm4, %v584_v55, %v582_v58 }
  0x9c   :  { %vm2430_vm11 = vcmp.eq.f32.partialorder %v1840_v20, inf  ;;  %v624_v5 = vsel %vm623_vm14, %v1843_v40, %v622_v31  ;;  %v782_v53 = vsub.f32 %v766_v23, %v774_v48  ;;  %vm2431_vm13 = vcmp.eq.f32.partialorder %v1828_v38, 0.0 }
  0x9d   :  { %v617_v56 = vsel %vm2430_vm11, %v1840_v20, %v615_v45  ;;  %v592_v61 = vsel %vm2431_vm13, %v591_v14, %v589_v62  ;;  %vm2432_vm15 = vcmp.eq.f32.partialorder %v1831_v46, 0.0  ;;  %v783_v55 = vsub.f32 %v767_v36, %v775_v49  ;;  %v1386_v15 = vpop.eup %1385 }
  0x9e   :  { %v599_v19 = vsel %vm2432_vm15, %v598_v52, %v596_v7  ;;  %v2051_v11 = vsub.f32 %v768_v47, %v776_v30  ;;  %v606_v17 = vsel %vm604_vm9, %v605_v44, %v603_v35  ;;  %v613_v57 = vsel %vm611_vm0, %v612_v24, %v610_v51  ;;  %v1388_v42 = vpop.eup %1387 }
  0x9f   :  { %v2061_v38 = vsub.f32 %v769_v6, %v777_v50  ;;  %v2063_v14 = vsub.f32 %v770_v9, %v778_v33  ;;  %v620_v46 = vsel %vm618_vm1, %v619_v54, %v617_v56  ;;  %v627_v52 = vsel %vm625_vm7, %v626_v8, %v624_v5 }
  0xa0   :  { %v789_v39 = vmul.f32 %v781_v59, %v781_v59  ;;  %v2072_v44 = vrot.slane %v788_v29, %v1699_v16  ;;  %v640_v25 = vcombine.high %v1386_v15, %v1386_v15  ;;  %v642_v24 = vrot.slane %v1386_v15, 1 }
  0xa1   :  { %v644_v18 = vrot.slane %v1386_v15, 2  ;;  %v646_v21 = vrot.slane %v1386_v15, 3  ;;  %vm2418_vm4 = vcmask 1041409   ;;  %v641_v22 = vcombine.high %v1388_v42, %v1388_v42 }
  0xa2   :  { %v648_v23 = vrot.slane %v1388_v42, 1  ;;  %v650_v26 = vrot.slane %v1388_v42, 2  ;;  %v652_v45 = vrot.slane %v1388_v42, 3  ;;  %vm2417_vm14 = vcmask 1045509  }
  0xa3   :  { %v643_v20 = vrot.slane %v640_v25, 1  ;;  %v645_v54 = vrot.slane %v640_v25, 2  ;;  %v647_v31 = vrot.slane %v640_v25, 3  ;;  %v670_v40 = vmul.f32 %v1386_v15, %v1886_v10 }
  0xa4   :  { %vm2416_vm0 = vcmask 1042434   ;;  %v649_v8 = vrot.slane %v641_v22, 1  ;;  %v651_v36 = vrot.slane %v641_v22, 2  ;;  %v653_v37 = vrot.slane %v641_v22, 3 }
  0xa5   :  { %v671_v58 = vmul.f32 %v640_v25, %v1925_v34  ;;  %vm2415_vm7 = vcmask 1046534   ;;  %v672_v47 = vmul.f32 %v642_v24, %v1935_v60  ;;  %v673_v48 = vmul.f32 %v643_v20, %v1948_v13  ;;  %v771_v24 = vld [vmem:[#allocation9 + $0x1c] sm:$0xf] }
  0xa6   :  { %v674_v62 = vmul.f32 %v644_v18, %v1974_v28  ;;  %v675_v7 = vmul.f32 %v645_v54, %v557_v41  ;;  %vm2414_vm9 = vcmask 1043459   ;;  %v676_v6 = vmul.f32 %v646_v21, %v564_v12 }
  0xa7   :  { %v677_v49 = vmul.f32 %v647_v31, %v571_v43  ;;  %v678_v30 = vmul.f32 %v1388_v42, %v578_v27  ;;  %v679_v35 = vmul.f32 %v641_v22, %v585_v4  ;;  %vm2413_vm1 = vcmask 1047559  }
  0xa8   :  { %v680_v10 = vmul.f32 %v648_v23, %v592_v61  ;;  %v681_v51 = vmul.f32 %v649_v8, %v599_v19  ;;  %v682_v9 = vmul.f32 %v650_v26, %v606_v17  ;;  %v683_v50 = vmul.f32 %v651_v36, %v613_v57 }
  0xa9   :  { %v684_v33 = vmul.f32 %v652_v45, %v620_v46  ;;  %v685_v34 = vmul.f32 %v653_v37, %v627_v52  ;;  %v702_v59 = vcombine.low %v670_v40, %v671_v58  ;;  %v703_v29 = vcombine.low %v672_v47, %v673_v48 }
  0xaa   :  { %v704_v60 = vcombine.low %v674_v62, %v675_v7  ;;  %v705_v56 = vcombine.low %v676_v6, %v677_v49  ;;  %v706_v13 = vcombine.low %v678_v30, %v679_v35  ;;  %v707_v5 = vcombine.low %v680_v10, %v681_v51 }
  0xab   :  { %v708_v28 = vcombine.low %v682_v9, %v683_v50  ;;  %v709_v41 = vcombine.low %v684_v33, %v685_v34  ;;  %v710_v15 = vrot.slane %v703_v29, 7  ;;  %v790_v12 = vmul.f32 %v782_v53, %v782_v53  ;;  %v779_v53 = vld [vmem:[%s2405_s7 + $0x1c] sm:$0xf] }
  0xac   :  { %v715_v43 = vrot.slane %v704_v60, 6  ;;  %v725_v27 = vrot.slane %v707_v5, 7  ;;  %v791_v4 = vmul.f32 %v783_v55, %v783_v55  ;;  %v811_v61 = vcombine.high %v2072_v44, %v2072_v44 }
  0xad   :  { %v712_v19 = vsel %vm2418_vm4, %v710_v15, %v702_v59  ;;  %v720_v17 = vrot.slane %v705_v56, 5  ;;  %v728_v57 = vrot.slane %v708_v28, 6  ;;  %v792_v46 = vmul.f32 %v2051_v11, %v2051_v11 }
  0xae   :  { %v714_v52 = vsel %vm2417_vm14, %v710_v15, %v712_v19  ;;  %v726_v42 = vsel %vm2418_vm4, %v725_v27, %v706_v13  ;;  %v731_v25 = vrot.slane %v709_v41, 5  ;;  %v818_v55 = vrot.slane %v789_v39, %v1699_v16 }
  0xaf   :  { %v717_v18 = vsel %vm2416_vm0, %v715_v43, %v714_v52  ;;  %v727_v21 = vsel %vm2417_vm14, %v725_v27, %v726_v42  ;;  %v793_v22 = vmul.f32 %v2061_v38, %v2061_v38  ;;  %v826_v11 = vrot.slane %v790_v12, %v1699_v16 }
  0xb0   :  { %v719_v23 = vsel %vm2415_vm7, %v715_v43, %v717_v18  ;;  %v729_v26 = vsel %vm2416_vm0, %v728_v57, %v727_v21  ;;  %vm2433_vm8 = vcmask 1041408   ;;  %v787_v31 = vsub.f32 %v771_v24, %v779_v53 }
  0xb1   :  { %v884_v45 = vsel %vm2433_vm8, %v2072_v44, 0.0  ;;  %vm2434_vm10 = vmmov %vm2433_vm8  ;;  %v722_v39 = vsel %vm2414_vm9, %v720_v17, %v719_v23  ;;  %v730_v54 = vsel %vm2415_vm7, %v728_v57, %v729_v26  ;;  %v834_v40 = vrot.slane %v791_v4, %v1699_v16 }
  0xb2   :  { %v891_v20 = vsel %vm2434_vm10, %v811_v61, 0.0  ;;  %v724_v38 = vsel %vm2413_vm1, %v720_v17, %v722_v39  ;;  %v732_v8 = vsel %vm2414_vm9, %v731_v25, %v730_v54  ;;  %v794_v36 = vmul.f32 %v2063_v14, %v2063_v14  ;;  %vm2436_vm12 = vmmov %vm2433_vm8 }
  0xb3   :  { %v819_v37 = vcombine.high %v818_v55, %v818_v55  ;;  %v733_v58 = vsel %vm2413_vm1, %v731_v25, %v732_v8  ;;  %v736_v44 = vadd.f32 %v724_v38, %v1979_v32  ;;  %v885_v47 = vrot.slane %v884_v45, 4  ;;  %vm2439_vm2 = vmmov %vm2433_vm8 }
  0xb4   :  { %v892_v48 = vrot.slane %v891_v20, 4  ;;  %v737_v62 = vadd.f32 %v733_v58, %v1996_v63  ;;  %v827_v7 = vcombine.high %v826_v11, %v826_v11  ;;  %v842_v6 = vrot.slane %v792_v46, %v1699_v16  ;;  %vm2441_vm13 = vmmov %vm2439_vm2 }
  0xb5   :  { %v850_v49 = vrot.slane %v793_v22, %v1699_v16  ;;  %v740_v30 = vcombine.high %v736_v44, %v736_v44  ;;  %vm2435_vm6 = vcmp.gt.f32.partialorder %v1626_v0, 0.5  ;;  %v835_v10 = vcombine.high %v834_v40, %v834_v40 }
  0xb6   :  { %v744_v35 = vsel %vm2435_vm6, %v736_v44, 0.0  ;;  %v898_v14 = vsel %vm2436_vm12, %v818_v55, 0.0  ;;  %v741_v51 = vcombine.high %v737_v62, %v737_v62  ;;  %vm2437_vm5 = vcmp.gt.f32.partialorder %v1636_v2, 0.5  ;;  %vm2446_vm12 = vmmov %vm2439_vm2 }
  0xb7   :  { %v746_v32 = vsel %vm2437_vm5, %v737_v62, 0.0  ;;  %vm2438_vm3 = vcmask 1043456   ;;  %v905_v63 = vsel %vm2439_vm2, %v819_v37, 0.0  ;;  %vm2440_vm11 = vcmp.gt.f32.partialorder %v1631_v1, 0.5  ;;  %vm2447_vm5 = vmmov %vm2439_vm2 }
  0xb8   :  { %v748_v9 = vsel %vm2438_vm3, %v744_v35, 0.0  ;;  %v745_v50 = vsel %vm2440_vm11, %v740_v30, 0.0  ;;  %v886_v33 = vadd.f32 %v885_v47, %v884_v45  ;;  %v893_v34 = vadd.f32 %v892_v48, %v891_v20  ;;  %vm2443_vm8 = vmmov %vm2438_vm3 }
  0xb9   :  { %v912_v59 = vsel %vm2441_vm13, %v826_v11, 0.0  ;;  %vm2442_vm15 = vcmp.gt.f32.partialorder %v1641_v3, 0.5  ;;  %v749_v60 = vsel %vm2443_vm8, %v745_v50, 0.0  ;;  %vm2444_vm10 = vmmov %vm2438_vm3  ;;  %v899_v13 = vrot.slane %v898_v14, 4 }
  0xba   :  { %v747_v29 = vsel %vm2442_vm15, %v741_v51, 0.0  ;;  %v751_v56 = vsel %vm2444_vm10, %v746_v32, 0.0  ;;  %v750_v5 = vadd.f32 %v749_v60, %v748_v9  ;;  %v795_v28 = vmul.f32 %v787_v31, %v787_v31  ;;  %vm2445_vm6 = vmmov %vm2438_vm3 }
  0xbb   :  { %v906_v41 = vrot.slane %v905_v63, 4  ;;  %v753_v15 = vsel %vm2445_vm6, %v747_v29, 0.0  ;;  %v843_v12 = vcombine.high %v842_v6, %v842_v6  ;;  %v913_v43 = vrot.slane %v912_v59, 4  ;;  %vm2448_vm3 = vmmov %vm2439_vm2 }
  0xbc   :  { %v919_v27 = vsel %vm2446_vm12, %v827_v7, 0.0  ;;  %v752_v4 = vadd.f32 %v751_v56, %v750_v5  ;;  %v851_v61 = vcombine.high %v850_v49, %v850_v49  ;;  %v858_v19 = vrot.slane %v794_v36, %v1699_v16  ;;  %vm2449_vm11 = vmmov %vm2439_vm2 }
  0xbd   :  { %v926_v17 = vsel %vm2447_vm5, %v834_v40, 0.0  ;;  %v887_v57 = vrot.slane %v886_v33, 2  ;;  %v894_v46 = vrot.slane %v893_v34, 2  ;;  %v900_v52 = vadd.f32 %v899_v13, %v898_v14  ;;  %vm2450_vm13 = vmmov %vm2439_vm2 }
  0xbe   :  { %v933_v42 = vsel %vm2448_vm3, %v835_v10, 0.0  ;;  %v754_v25 = vadd.f32 %v753_v15, %v752_v4  ;;  %v907_v24 = vadd.f32 %v906_v41, %v905_v63  ;;  %v920_v53 = vrot.slane %v919_v27, 4  ;;  %vm2451_vm15 = vmmov %vm2439_vm2 }
  0xbf   :  { %v940_v55 = vsel %vm2439_vm2, %v842_v6, 0.0  ;;  %v914_v18 = vadd.f32 %v913_v43, %v912_v59  ;;  %v927_v21 = vrot.slane %v926_v17, 4  ;;  %v947_v22 = vsel %vm2449_vm11, %v843_v12, 0.0  ;;  %vm2452_vm8 = vmmov %vm2439_vm2 }
  0xc0   :  { %755 = vadd.xlane.f32.xlu1 %v754_v25  ;;  %v859_v11 = vcombine.high %v858_v19, %v858_v19  ;;  %v866_v23 = vrot.slane %v795_v28, %v1699_v16  ;;  %v934_v26 = vrot.slane %v933_v42, 4  ;;  %v954_v45 = vsel %vm2450_vm13, %v850_v49, 0.0  ;;  %vm2453_vm10 = vmmov %vm2439_vm2 }
  0xc1   :  { %v888_v20 = vadd.f32 %v887_v57, %v886_v33  ;;  %v895_v39 = vadd.f32 %v894_v46, %v893_v34  ;;  %v941_v54 = vrot.slane %v940_v55, 4  ;;  %v961_v31 = vsel %vm2451_vm15, %v851_v61, 0.0  ;;  %vm2454_vm6 = vmmov %vm2439_vm2 }
  0xc2   :  { %v901_v40 = vrot.slane %v900_v52, 2  ;;  %v908_v38 = vrot.slane %v907_v24, 2  ;;  %v921_v8 = vadd.f32 %v920_v53, %v919_v27  ;;  %v948_v36 = vrot.slane %v947_v22, 4  ;;  %vm2455_vm12 = vmmov %vm2439_vm2 }
  0xc3   :  { %v915_v37 = vrot.slane %v914_v18, 2  ;;  %v928_v58 = vadd.f32 %v927_v21, %v926_v17  ;;  %v955_v44 = vrot.slane %v954_v45, 4  ;;  %v968_v47 = vsel %vm2452_vm8, %v858_v19, 0.0 }
  0xc4   :  { %v867_v48 = vcombine.high %v866_v23, %v866_v23  ;;  %v935_v62 = vadd.f32 %v934_v26, %v933_v42  ;;  %v962_v16 = vrot.slane %v961_v31, 4  ;;  %v889_v7 = vrot.slane %v888_v20, 1 }
  0xc5   :  { %v896_v6 = vrot.slane %v895_v39, 1  ;;  %v942_v49 = vadd.f32 %v941_v54, %v940_v55  ;;  %v969_v30 = vrot.slane %v968_v47, 4  ;;  %v902_v35 = vadd.f32 %v901_v40, %v900_v52 }
  0xc6   :  { %v909_v10 = vadd.f32 %v908_v38, %v907_v24  ;;  %v922_v14 = vrot.slane %v921_v8, 2  ;;  %v949_v51 = vadd.f32 %v948_v36, %v947_v22  ;;  %v916_v32 = vadd.f32 %v915_v37, %v914_v18 }
  0xc7   :  { %v929_v9 = vrot.slane %v928_v58, 2  ;;  %v956_v63 = vadd.f32 %v955_v44, %v954_v45  ;;  %v975_v50 = vsel %vm2453_vm10, %v859_v11, 0.0  ;;  %v936_v33 = vrot.slane %v935_v62, 2 }
  0xc8   :  { %v963_v34 = vadd.f32 %v962_v16, %v961_v31  ;;  %v976_v59 = vrot.slane %v975_v50, 4  ;;  %v982_v29 = vsel %vm2454_vm6, %v866_v23, 0.0  ;;  %v943_v60 = vrot.slane %v942_v49, 2 }
  0xc9   :  { %v970_v56 = vadd.f32 %v969_v30, %v968_v47  ;;  %v983_v13 = vrot.slane %v982_v29, 4  ;;  %v989_v5 = vsel %vm2455_vm12, %v867_v48, 0.0  ;;  %v923_v28 = vadd.f32 %v922_v14, %v921_v8 }
  0xca   :  { %v950_v41 = vrot.slane %v949_v51, 2  ;;  %v977_v15 = vadd.f32 %v976_v59, %v975_v50  ;;  %v990_v12 = vrot.slane %v989_v5, 4  ;;  %v903_v43 = vrot.slane %v902_v35, 1 }
  0xcb   :  { %v930_v27 = vadd.f32 %v929_v9, %v928_v58  ;;  %v957_v4 = vrot.slane %v956_v63, 2  ;;  %v984_v61 = vadd.f32 %v983_v13, %v982_v29  ;;  %v910_v19 = vrot.slane %v909_v10, 1  ;;  %v2194_v13 = vld [vmem:[#allocation11] sm:$0xff] }
  0xcc   :  { %v917_v17 = vrot.slane %v916_v32, 1  ;;  %v937_v57 = vadd.f32 %v936_v33, %v935_v62  ;;  %v964_v46 = vrot.slane %v963_v34, 2  ;;  %v2140_v52 = vadd.f32 %v889_v7, %v888_v20 }
  0xcd   :  { %v944_v42 = vadd.f32 %v943_v60, %v942_v49  ;;  %v971_v25 = vrot.slane %v970_v56, 2  ;;  %v991_v24 = vadd.f32 %v990_v12, %v989_v5  ;;  %v2142_v53 = vadd.f32 %v896_v6, %v895_v39 }
  0xce   :  { %v924_v55 = vrot.slane %v923_v28, 1  ;;  %v951_v18 = vadd.f32 %v950_v41, %v949_v51  ;;  %v978_v21 = vrot.slane %v977_v15, 2  ;;  %v2144_v22 = vadd.f32 %v903_v43, %v902_v35 }
  0xcf   :  { %v931_v11 = vrot.slane %v930_v27, 1  ;;  %v958_v23 = vadd.f32 %v957_v4, %v956_v63  ;;  %v985_v26 = vrot.slane %v984_v61, 2  ;;  %v2146_v45 = vadd.f32 %v910_v19, %v909_v10 }
  0xd0   :  { %v2148_v54 = vadd.f32 %v917_v17, %v916_v32  ;;  %v938_v31 = vrot.slane %v937_v57, 1  ;;  %v965_v20 = vadd.f32 %v964_v46, %v963_v34  ;;  %v945_v40 = vrot.slane %v944_v42, 1 }
  0xd1   :  { %v972_v38 = vadd.f32 %v971_v25, %v970_v56  ;;  %v992_v8 = vrot.slane %v991_v24, 2  ;;  %1389 = vrsqrt.f32 %v2140_v52  ;;  %v2151_v39 = vadd.f32 %v924_v55, %v923_v28 }
  0xd2   :  { %v952_v36 = vrot.slane %v951_v18, 1  ;;  %v979_v37 = vadd.f32 %v978_v21, %v977_v15  ;;  %1391 = vrsqrt.f32 %v2142_v53  ;;  %v2154_v58 = vadd.f32 %v931_v11, %v930_v27  ;;  %v2202_v15 = vld [vmem:[#allocation11 + $0x8] sm:$0xff] }
  0xd3   :  { %v959_v44 = vrot.slane %v958_v23, 1  ;;  %v986_v47 = vadd.f32 %v985_v26, %v984_v61  ;;  %1393 = vrsqrt.f32 %v2144_v22  ;;  %v2157_v48 = vadd.f32 %v938_v31, %v937_v57 }
  0xd4   :  { %v966_v62 = vrot.slane %v965_v20, 1  ;;  %1395 = vrsqrt.f32 %v2146_v45  ;;  %v2160_v16 = vadd.f32 %v945_v40, %v944_v42  ;;  %v973_v7 = vrot.slane %v972_v38, 1 }
  0xd5   :  { %v993_v6 = vadd.f32 %v992_v8, %v991_v24  ;;  %1397 = vrsqrt.f32 %v2148_v54  ;;  %v2163_v49 = vadd.f32 %v952_v36, %v951_v18  ;;  %v980_v30 = vrot.slane %v979_v37, 1 }
  0xd6   :  { %1399 = vrsqrt.f32 %v2151_v39  ;;  %v2166_v35 = vadd.f32 %v959_v44, %v958_v23  ;;  %v987_v10 = vrot.slane %v986_v47, 1  ;;  %v2169_v14 = vadd.f32 %v966_v62, %v965_v20 }
  0xd7   :  { %1401 = vrsqrt.f32 %v2154_v58  ;;  %v2172_v51 = vadd.f32 %v973_v7, %v972_v38  ;;  %v994_v32 = vrot.slane %v993_v6, 1  ;;  %v2175_v9 = vadd.f32 %v980_v30, %v979_v37 }
  0xd8   :  { %1403 = vrsqrt.f32 %v2157_v48  ;;  %v2178_v63 = vadd.f32 %v987_v10, %v986_v47  ;;  %vm998_vm5 = vcmp.eq.f32.partialorder %v2140_v52, inf  ;;  %vm1000_vm3 = vcmp.eq.f32.partialorder %v2140_v52, 0.0 }
  0xd9   :  { %1405 = vrsqrt.f32 %v2160_v16  ;;  %v2182_v50 = vadd.f32 %v994_v32, %v993_v6  ;;  %v1001_v29 = vand.u32 2147483648, %v2140_v52  ;;  %vm1005_vm2 = vcmp.eq.f32.partialorder %v2142_v53, inf }
  0xda   :  { %1407 = vrsqrt.f32 %v2163_v49  ;;  %vm1007_vm11 = vcmp.eq.f32.partialorder %v2142_v53, 0.0  ;;  %v1008_v41 = vand.u32 2147483648, %v2142_v53  ;;  %vm1012_vm13 = vcmp.eq.f32.partialorder %v2144_v22, inf }
  0xdb   :  { %1409 = vrsqrt.f32 %v2166_v35  ;;  %vm1014_vm15 = vcmp.eq.f32.partialorder %v2144_v22, 0.0  ;;  %v1015_v27 = vand.u32 2147483648, %v2144_v22  ;;  %vm1019_vm8 = vcmp.eq.f32.partialorder %v2146_v45, inf }
  0xdc   :  { %1411 = vrsqrt.f32 %v2169_v14  ;;  %v1022_v4 = vand.u32 2147483648, %v2146_v45  ;;  %vm1021_vm10 = vcmp.eq.f32.partialorder %v2146_v45, 0.0  ;;  %v1029_v19 = vand.u32 2147483648, %v2148_v54 }
  0xdd   :  { %1413 = vrsqrt.f32 %v2172_v51  ;;  %v1036_v17 = vand.u32 2147483648, %v2151_v39  ;;  %v1043_v57 = vand.u32 2147483648, %v2154_v58  ;;  %v1112_v46 = vsub.f32 0.0, %v2194_v13 }
  0xde   :  { %v1390_v33 = vpop.eup %1389  ;;  %1415 = vrsqrt.f32 %v2175_v9  ;;  %vm1026_vm6 = vcmp.eq.f32.partialorder %v2148_v54, inf  ;;  %vm1033_vm12 = vcmp.eq.f32.partialorder %v2151_v39, inf  ;;  %vm1040_vm1 = vcmp.eq.f32.partialorder %v2154_v58, inf }
  0xdf   :  { %v1392_v34 = vpop.eup %1391  ;;  %1417 = vrsqrt.f32 %v2178_v63  ;;  %v997_v56 = vmul.f32 %v1390_v33, %v2140_v52  ;;  %vm1047_vm9 = vcmp.eq.f32.partialorder %v2157_v48, inf  ;;  %v1050_v24 = vand.u32 2147483648, %v2157_v48 }
  0xe0   :  { %v1394_v59 = vpop.eup %1393  ;;  %1419 = vrsqrt.f32 %v2182_v50  ;;  %v1004_v28 = vmul.f32 %v1392_v34, %v2142_v53  ;;  %v1057_v55 = vand.u32 2147483648, %v2160_v16  ;;  %v1113_v18 = vsub.f32 0.0, %v2202_v15 }
  0xe1   :  { %v1396_v60 = vpop.eup %1395  ;;  %v1011_v43 = vmul.f32 %v1394_v59, %v2144_v22  ;;  %v999_v25 = vsel %vm998_vm5, %v2140_v52, %v997_v56  ;;  %vm1054_vm5 = vcmp.eq.f32.partialorder %v2160_v16, inf  ;;  %vm1061_vm7 = vcmp.eq.f32.partialorder %v2163_v49, inf }
  0xe2   :  { %v2196_v5 = vpop.eup %1397  ;;  %v1006_v11 = vsel %vm1005_vm2, %v2142_v53, %v1004_v28  ;;  %v1064_v23 = vand.u32 2147483648, %v2163_v49  ;;  %v1114_v26 = vmul.f32 1.442695, %v1112_v46  ;;  %v1018_v40 = vmul.f32 %v1396_v60, %v2146_v45 }
  0xe3   :  { %v2204_v12 = vpop.eup %1399  ;;  %v1013_v20 = vsel %vm1012_vm13, %v2144_v22, %v1011_v43  ;;  %v1071_v38 = vand.u32 2147483648, %v2166_v35  ;;  %v1116_v8 = vmul.f32 1.442695, %v1113_v18  ;;  %v2239_v37 = vsel %vm1000_vm3, %v1001_v29, %v999_v25 }
  0xe4   :  { %v1402_v61 = vpop.eup %1401  ;;  %vm1075_vm13 = vcmp.eq.f32.partialorder %v2169_v14, inf  ;;  %v1078_v44 = vand.u32 2147483648, %v2169_v14  ;;  %1421 = vpow2.f32 %v1114_v26  ;;  %v2249_v62 = vsel %vm1007_vm11, %v1008_v41, %v1006_v11 }
  0xe5   :  { %v1404_v42 = vpop.eup %1403  ;;  %vm1082_vm0 = vcmp.eq.f32.partialorder %v2172_v51, inf  ;;  %v1085_v52 = vand.u32 2147483648, %v2172_v51  ;;  %1423 = vpow2.f32 %v1116_v8  ;;  %v2259_v6 = vsel %vm1014_vm15, %v1015_v27, %v1013_v20 }
  0xe6   :  { %v1406_v21 = vpop.eup %1405  ;;  %vm1084_vm11 = vcmp.eq.f32.partialorder %v2172_v51, 0.0  ;;  %vm1089_vm3 = vcmp.eq.f32.partialorder %v2175_v9, inf  ;;  %vm1091_vm2 = vcmp.eq.f32.partialorder %v2175_v9, 0.0  ;;  %v1092_v53 = vand.u32 2147483648, %v2175_v9 }
  0xe7   :  { %v1408_v31 = vpop.eup %1407  ;;  %v1020_v10 = vsel %vm1019_vm8, %v2146_v45, %v1018_v40  ;;  %vm1096_vm4 = vcmp.eq.f32.partialorder %v2178_v63, inf  ;;  %vm1098_vm14 = vcmp.eq.f32.partialorder %v2178_v63, 0.0  ;;  %v1099_v22 = vand.u32 2147483648, %v2178_v63 }
  0xe8   :  { %v1410_v36 = vpop.eup %1409  ;;  %v1025_v33 = vmul.f32 %v2196_v5, %v2148_v54  ;;  %v1032_v34 = vmul.f32 %v2204_v12, %v2151_v39  ;;  %v1039_v59 = vmul.f32 %v1402_v61, %v2154_v58  ;;  %v1046_v29 = vmul.f32 %v1404_v42, %v2157_v48 }
  0xe9   :  { %v1412_v47 = vpop.eup %1411  ;;  %v1053_v60 = vmul.f32 %v1406_v21, %v2160_v16  ;;  %v1060_v56 = vmul.f32 %v1408_v31, %v2163_v49  ;;  %v1067_v28 = vmul.f32 %v1410_v36, %v2166_v35  ;;  %vm1103_vm15 = vcmp.eq.f32.partialorder %v2182_v50, inf }
  0xea   :  { %v1414_v7 = vpop.eup %1413  ;;  %v1074_v41 = vmul.f32 %v1412_v47, %v2169_v14  ;;  %v1023_v12 = vsel %vm1021_vm10, %v1022_v4, %v1020_v10  ;;  %vm1105_vm8 = vcmp.eq.f32.partialorder %v2182_v50, 0.0  ;;  %v1106_v42 = vand.u32 2147483648, %v2182_v50 }
  0xeb   :  { %v1416_v30 = vpop.eup %1415  ;;  %v1081_v27 = vmul.f32 %v1414_v7, %v2172_v51  ;;  %v1027_v25 = vsel %vm1026_vm6, %v2148_v54, %v1025_v33  ;;  %v1034_v18 = vsel %vm1033_vm12, %v2151_v39, %v1032_v34  ;;  %v1041_v21 = vsel %vm1040_vm1, %v2154_v58, %v1039_v59 }
  0xec   :  { %v1418_v32 = vpop.eup %1417  ;;  %v1088_v5 = vmul.f32 %v1416_v30, %v2175_v9  ;;  %v1048_v45 = vsel %vm1047_vm9, %v2157_v48, %v1046_v29  ;;  %v1055_v4 = vsel %vm1054_vm5, %v2160_v16, %v1053_v60  ;;  %v1062_v11 = vsel %vm1061_vm7, %v2163_v49, %v1060_v56 }
  0xed   :  { %v1420_v43 = vpop.eup %1419  ;;  %v1095_v46 = vmul.f32 %v1418_v32, %v2178_v63  ;;  %vm2456_vm10 = vcmp.eq.f32.partialorder %v2166_v35, inf  ;;  %v1076_v31 = vsel %vm1075_vm13, %v2169_v14, %v1074_v41  ;;  %v1083_v20 = vsel %vm1082_vm0, %v2172_v51, %v1081_v27 }
  0xee   :  { %v1102_v61 = vmul.f32 %v1420_v43, %v2182_v50  ;;  %v1069_v26 = vsel %vm2456_vm10, %v2166_v35, %v1067_v28  ;;  %v1090_v40 = vsel %vm1089_vm3, %v2175_v9, %v1088_v5  ;;  %vm2457_vm7 = vcmp.eq.f32.partialorder %v2148_v54, 0.0 }
  0xef   :  { %v1097_v8 = vsel %vm1096_vm4, %v2178_v63, %v1095_v46  ;;  %v1030_v47 = vsel %vm2457_vm7, %v1029_v19, %v1027_v25  ;;  %vm2458_vm0 = vcmp.eq.f32.partialorder %v2151_v39, 0.0  ;;  %vm2459_vm9 = vcmp.eq.f32.partialorder %v2154_v58, 0.0 }
  0xf0   :  { %v1104_v36 = vsel %vm1103_vm15, %v2182_v50, %v1102_v61  ;;  %v1037_v7 = vsel %vm2458_vm0, %v1036_v17, %v1034_v18  ;;  %v1044_v30 = vsel %vm2459_vm9, %v1043_v57, %v1041_v21  ;;  %vm2460_vm4 = vcmp.eq.f32.partialorder %v2157_v48, 0.0 }
  0xf1   :  { %v1051_v10 = vsel %vm2460_vm4, %v1050_v24, %v1048_v45  ;;  %vm2461_vm1 = vcmp.eq.f32.partialorder %v2160_v16, 0.0  ;;  %vm2462_vm6 = vcmp.eq.f32.partialorder %v2163_v49, 0.0  ;;  %vm2463_vm12 = vcmp.eq.f32.partialorder %v2166_v35, 0.0  ;;  %v1422_v48 = vpop.eup %1421 }
  0xf2   :  { %v1058_v54 = vsel %vm2461_vm1, %v1057_v55, %v1055_v4  ;;  %v1065_v39 = vsel %vm2462_vm6, %v1064_v23, %v1062_v11  ;;  %v1072_v58 = vsel %vm2463_vm12, %v1071_v38, %v1069_v26  ;;  %vm2464_vm5 = vcmp.eq.f32.partialorder %v2169_v14, 0.0  ;;  %v1424_v24 = vpop.eup %1423 }
  0xf3   :  { %v1079_v19 = vsel %vm2464_vm5, %v1078_v44, %v1076_v31  ;;  %v1086_v17 = vsel %vm1084_vm11, %v1085_v52, %v1083_v20  ;;  %v1093_v16 = vsel %vm1091_vm2, %v1092_v53, %v1090_v40  ;;  %v1100_v57 = vsel %vm1098_vm14, %v1099_v22, %v1097_v8 }
  0xf4   :  { %v1107_v49 = vsel %vm1105_vm8, %v1106_v42, %v1104_v36  ;;  %v1120_v55 = vcombine.high %v1422_v48, %v1422_v48  ;;  %v1122_v35 = vrot.slane %v1422_v48, 1  ;;  %v1124_v23 = vrot.slane %v1422_v48, 2 }
  0xf5   :  { %v1126_v38 = vrot.slane %v1422_v48, 3  ;;  %v1121_v14 = vcombine.high %v1424_v24, %v1424_v24  ;;  %v1128_v44 = vrot.slane %v1424_v24, 1  ;;  %v1130_v32 = vrot.slane %v1424_v24, 2 }
  0xf6   :  { %v1132_v33 = vrot.slane %v1424_v24, 3  ;;  %v1123_v51 = vrot.slane %v1120_v55, 1  ;;  %v1125_v52 = vrot.slane %v1120_v55, 2  ;;  %v1127_v34 = vrot.slane %v1120_v55, 3 }
  0xf7   :  { %v1150_v9 = vmul.f32 %v1422_v48, %v2239_v37  ;;  %v1129_v53 = vrot.slane %v1121_v14, 1  ;;  %v1131_v63 = vrot.slane %v1121_v14, 2  ;;  %v1133_v22 = vrot.slane %v1121_v14, 3 }
  0xf8   :  { %v1151_v50 = vmul.f32 %v1120_v55, %v2249_v62  ;;  %v1152_v59 = vmul.f32 %v1122_v35, %v2259_v6  ;;  %v1153_v29 = vmul.f32 %v1123_v51, %v1023_v12  ;;  %v1154_v60 = vmul.f32 %v1124_v23, %v1030_v47  ;;  %v275_v51 = vpop.xlane.xlu1 %274 }
  0xf9   :  { %v1155_v56 = vmul.f32 %v1125_v52, %v1037_v7  ;;  %v1156_v28 = vmul.f32 %v1126_v38, %v1044_v30  ;;  %v1157_v41 = vmul.f32 %v1127_v34, %v1051_v10  ;;  %v1158_v43 = vmul.f32 %v1424_v24, %v1058_v54  ;;  %v251_v10 = vpop.xlane.xlu0 %250 }
  0xfa   :  { %v1159_v27 = vmul.f32 %v1121_v14, %v1065_v39  ;;  %v1160_v5 = vmul.f32 %v1128_v44, %v1072_v58  ;;  %v1161_v46 = vmul.f32 %v1129_v53, %v1079_v19  ;;  %v1162_v61 = vmul.f32 %v1130_v32, %v1086_v17 }
  0xfb   :  { %v1163_v42 = vmul.f32 %v1131_v63, %v1093_v16  ;;  %v1164_v25 = vmul.f32 %v1132_v33, %v1100_v57  ;;  %v1165_v37 = vmul.f32 %v1133_v22, %v1107_v49  ;;  %v1182_v18 = vcombine.low %v1150_v9, %v1151_v50 }
  0xfc   :  { %v1183_v21 = vcombine.low %v1152_v59, %v1153_v29  ;;  %v1184_v45 = vcombine.low %v1154_v60, %v1155_v56  ;;  %v1185_v4 = vcombine.low %v1156_v28, %v1157_v41  ;;  %v1186_v62 = vcombine.low %v1158_v43, %v1159_v27 }
  0xfd   :  { %v1187_v11 = vcombine.low %v1160_v5, %v1161_v46  ;;  %v1188_v6 = vcombine.low %v1162_v61, %v1163_v42  ;;  %v1189_v12 = vcombine.low %v1164_v25, %v1165_v37  ;;  %vm2465_vm14 = vcmask 1041409   ;;  %v230_v23 = vpop.xlane.xlu0 %229 }
  0xfe   :  { %v1190_v26 = vrot.slane %v1183_v21, 7  ;;  %v1193_v31 = vrot.slane %v1184_v45, 6  ;;  %v1196_v8 = vrot.slane %v1185_v4, 5  ;;  %vm2466_vm2 = vcmask 1045509   ;;  %vm2467_vm13 = vmmov %vm2465_vm14 }
  0xff   :  { %v1199_v20 = vrot.slane %v1187_v11, 7  ;;  %v1202_v36 = vrot.slane %v1188_v6, 6  ;;  %v1205_v30 = vrot.slane %v1189_v12, 5  ;;  %v1110_v54 = vadd.f32 0.694, %v2194_v13  ;;  %vm2469_vm11 = vmmov %vm2466_vm2 }
 0x100   :  { %v1191_v40 = vsel %vm2465_vm14, %v1190_v26, %v1182_v18  ;;  %vm2468_vm3 = vcmask 1042434   ;;  %v1111_v19 = vadd.f32 0.694, %v2202_v15  ;;  %vm2470_vm15 = vcmask 1046534  }
 0x101   :  { %v1192_v47 = vsel %vm2466_vm2, %v1190_v26, %v1191_v40  ;;  %v1200_v7 = vsel %vm2467_vm13, %v1199_v20, %v1186_v62  ;;  %vm2471_vm8 = vmmov %vm2468_vm3  ;;  %vm2472_vm10 = vcmask 1043459   ;;  %vm2474_vm0 = vcmask 1047559  }
 0x102   :  { %v1194_v39 = vsel %vm2468_vm3, %v1193_v31, %v1192_v47  ;;  %v1201_v58 = vsel %vm2469_vm11, %v1199_v20, %v1200_v7  ;;  %vm2473_vm7 = vmmov %vm2470_vm15  ;;  %vm2477_vm1 = vcmp.gt.f32.partialorder %v1626_v0, 0.5  ;;  %v252_v14 = vrot.slane %v251_v10, 4 }
 0x103   :  { %v1195_v48 = vsel %vm2470_vm15, %v1193_v31, %v1194_v39  ;;  %v1203_v17 = vsel %vm2471_vm8, %v1202_v36, %v1201_v58  ;;  %vm2475_vm9 = vmmov %vm2472_vm10  ;;  %vm2478_vm6 = vcmp.gt.f32.partialorder %v1636_v2, 0.5  ;;  %vm2479_vm12 = vcmask 1043456  }
 0x104   :  { %v1197_v16 = vsel %vm2472_vm10, %v1196_v8, %v1195_v48  ;;  %v1204_v57 = vsel %vm2473_vm7, %v1202_v36, %v1203_v17  ;;  %vm2476_vm4 = vmmov %vm2474_vm0  ;;  %vm2480_vm5 = vcmp.gt.f32.partialorder %v1631_v1, 0.5  ;;  %v231_v34 = vrot.slane %v230_v23, 4 }
 0x105   :  { %v1198_v49 = vsel %vm2474_vm0, %v1196_v8, %v1197_v16  ;;  %v1206_v24 = vsel %vm2475_vm9, %v1205_v30, %v1204_v57  ;;  %vm2481_vm14 = vcmp.gt.f32.partialorder %v1641_v3, 0.5  ;;  %vm2482_vm2 = vmmov %vm2479_vm12  ;;  %v253_v22 = vadd.f32 %v252_v14, %v251_v10 }
 0x106   :  { %v1207_v13 = vsel %vm2476_vm4, %v1205_v30, %v1206_v24  ;;  %v1210_v55 = vadd.f32 %v1198_v49, %v1110_v54  ;;  %vm2483_vm13 = vmmov %vm2482_vm2  ;;  %v276_v50 = vrot.slane %v275_v51, 4  ;;  %v232_v29 = vadd.f32 %v231_v34, %v230_v23 }
 0x107   :  { %v1211_v35 = vadd.f32 %v1207_v13, %v1111_v19  ;;  %vm2484_vm3 = vmmov %vm2482_vm2  ;;  %v254_v56 = vrot.slane %v253_v22, 2 }
 0x108   :  { %v1214_v38 = vcombine.high %v1210_v55, %v1210_v55  ;;  %v1218_v15 = vsel %vm2477_vm1, %v1210_v55, 0.0  ;;  %v277_v28 = vadd.f32 %v276_v50, %v275_v51  ;;  %v233_v1 = vrot.slane %v232_v29, 2 }
 0x109   :  { %v1215_v44 = vcombine.high %v1211_v35, %v1211_v35  ;;  %v1220_v32 = vsel %vm2478_vm6, %v1211_v35, 0.0  ;;  %v1222_v33 = vsel %vm2479_vm12, %v1218_v15, 0.0  ;;  %v255_v43 = vadd.f32 %v254_v56, %v253_v22 }
 0x10a   :  { %v1219_v52 = vsel %vm2480_vm5, %v1214_v38, 0.0  ;;  %v1225_v0 = vsel %vm2483_vm13, %v1220_v32, 0.0  ;;  %v278_v41 = vrot.slane %v277_v28, 2  ;;  %v234_v3 = vadd.f32 %v233_v1, %v232_v29 }
 0x10b   :  { %v1221_v9 = vsel %vm2481_vm14, %v1215_v44, 0.0  ;;  %v1223_v53 = vsel %vm2482_vm2, %v1219_v52, 0.0  ;;  %v256_v27 = vrot.slane %v255_v43, 1 }
 0x10c   :  { %v1224_v63 = vadd.f32 %v1223_v53, %v1222_v33  ;;  %v1227_v2 = vsel %vm2484_vm3, %v1221_v9, 0.0  ;;  %v235_v5 = vrot.slane %v234_v3, 1  ;;  %v279_v46 = vadd.f32 %v278_v41, %v277_v28 }
 0x10d   :  { %v257_v25 = vadd.f32 %v256_v27, %v255_v43 }
 0x10e   :  { %v1226_v59 = vadd.f32 %v1225_v0, %v1224_v63  ;;  %v236_v61 = vadd.f32 %v235_v5, %v234_v3  ;;  %v280_v42 = vrot.slane %v279_v46, 1 }
 0x110   :  { %v1228_v60 = vadd.f32 %v1227_v2, %v1226_v59  ;;  %1320 = vpush %v236_v61  ;;  %v281_v37 = vadd.f32 %v280_v42, %v279_v46 }
 0x111   :  { %1322 = vpush %v257_v25 }
 0x112   :  { %1229 = vadd.xlane.f32.xlu0 %v1228_v60  ;;  %1324 = vpush %v281_v37 }
 0x141   :  { %s1321_s7 = spop %1320 }
 0x142   :  { %1263 = sst [smem:[#allocation12]] %s1321_s7  ;;  %s1323_s17 = spop %1322 }
 0x143   :  { %1266 = sst [smem:[#allocation12 + $0x1]] %s1323_s17  ;;  %s1325_s18 = spop %1324 }
 0x144   :  { %1269 = sst [smem:[#allocation12 + $0x2]] %s1325_s18 }
 0x149   :  { %v756_v18 = vpop.xlane.xlu1 %755 }
 0x14a   :  { %v757_v21 = vrot.slane %v756_v18, 4 }
 0x14c   :  { %v758_v45 = vadd.f32 %v757_v21, %v756_v18 }
 0x14e   :  { %v759_v4 = vrot.slane %v758_v45, 2 }
 0x150   :  { %v760_v62 = vadd.f32 %v759_v4, %v758_v45 }
 0x152   :  { %v761_v11 = vrot.slane %v760_v62, 1 }
 0x154   :  { %v762_v6 = vadd.f32 %v761_v11, %v760_v62 }
 0x156   :  { %1326 = vpush %v762_v6 }
 0x187   :  { %s1327_s20 = spop %1326 }
 0x188   :  { %1272 = sst [smem:[#allocation12 + $0x3]] %s1327_s20 }
 0x19b   :  { %v1230_v12 = vpop.xlane.xlu0 %1229 }
 0x19c   :  { %v1231_v26 = vrot.slane %v1230_v12, 4 }
 0x19e   :  { %v1232_v31 = vadd.f32 %v1231_v26, %v1230_v12 }
 0x1a0   :  { %v1233_v20 = vrot.slane %v1232_v31, 2 }
 0x1a2   :  { %v1234_v40 = vadd.f32 %v1233_v20, %v1232_v31 }
 0x1a4   :  { %v1235_v8 = vrot.slane %v1234_v40, 1 }
 0x1a6   :  { %v1236_v36 = vadd.f32 %v1235_v8, %v1234_v40 }
 0x1a8   :  { %1328 = vpush %v1236_v36 }
 0x1d9   :  { %s1329_s3 = spop %1328 }
 0x1da   :  { %1275 = sst [smem:[#allocation12 + $0x4]] %s1329_s3 }
 0x1db   :  { %1292 = dma.smem_to_hbm %s1553_s21, 16, %s2406_s8, [#allocation5]  }
 0x1dc   :  { %1539 = dma.done.wait [#allocation5], 16  }
 0x1dd   :  { %1540 = vsyncadd [#allocation5], 4294967280 }
 0x1de   :  { %1296 = sfence }
 0x1df   :  { %1297 = vsyncpa [#allocation4], 1 }
 0x1e0   :  { %1298 = vsyncpa [#allocation7], 1 }
 0x1e1   :  { %1299 = vsyncpa [#allocation10], 1 }
 0x1e2   :  { %1300 = vsyncpa [#allocation5], 1 }

</bundles_post_ra>
